<compile_context>
chip_gen: v7x
topology: tpu7x:2x2x1
jax: 0.10.0
libtpu: 0.0.40
codegen_flags: <defaults>
</compile_context>

<pallas_src>
import functools

import jax
import jax.numpy as jnp
from jax import lax
from jax.experimental import pallas as pl
from jax.experimental.pallas import tpu as pltpu

_HP = 128  # per-projection lane width (head dim padded to a full vreg lane width)


def self_attention_kernel(x_ref, w_ref, o_ref, *, head_size, q_tile):
    # x_ref: (1, T, E) bf16   w_ref: (E, 3*Hp) bf16   o_ref: (1, tq, Hp)
    H = head_size
    i = pl.program_id(1)

    x_full = x_ref[0]                                            # (T, E) bf16
    q_start = pl.multiple_of(i * q_tile, q_tile)
    x_q = x_ref[0, pl.ds(q_start, q_tile), :]                    # (tq, E) bf16

    # Projections: bf16 MXU operands, f32 accumulation.  Weight slices are on
    # 128-lane boundaries, so no relayout.
    q = jnp.dot(x_q, w_ref[:, :_HP],
                preferred_element_type=jnp.float32)              # (tq, Hp) f32
    kv = jnp.dot(x_full, w_ref[:, _HP:],
                 preferred_element_type=jnp.float32)             # (T, 2*Hp) f32
    k = kv[:, :_HP]
    v = kv[:, _HP:]

    # Scale on q (tq*Hp elems) with the *real* head size, then drop to bf16 for
    # the MXU.  Padded lanes of q/k are zero, so they add nothing to the scores.
    q = (q * (H ** -0.5)).astype(jnp.bfloat16)
    k = k.astype(jnp.bfloat16)
    v = v.astype(jnp.bfloat16)

    # scores = q @ k^T without materializing k.T (contract last dims directly).
    s = lax.dot_general(q, k,
                        dimension_numbers=(((1,), (1,)), ((), ())),
                        preferred_element_type=jnp.float32)      # (tq, T) f32

    # Causal mask offset by this q-tile (diagonal kept -> no all--inf rows).
    T = s.shape[1]
    row = lax.broadcasted_iota(jnp.int32, (q_tile, T), 0) + i * q_tile
    col = lax.broadcasted_iota(jnp.int32, (q_tile, T), 1)
    s = jnp.where(col <= row, s, -jnp.inf)

    # Row-wise softmax stats in f32; normalization is deferred past the PV
    # matmul so the VPU multiply touches (tq, Hp) instead of (tq, T).
    m = jnp.max(s, axis=-1, keepdims=True)
    p = jnp.exp(s - m)
    l = jnp.sum(p, axis=-1, keepdims=True)                       # (tq, 1) f32

    out = jnp.dot(p.astype(jnp.bfloat16), v,
                  preferred_element_type=jnp.float32)            # (tq, Hp) f32
    out = out * pl.reciprocal(l, approx=True)                    # EUP slot
    o_ref[0] = out.astype(o_ref.dtype)


def build_qkv_weight(wq, wk, wv):
    """Init-time: pad each (E, H) projection to 128 lanes, fuse, cast to bf16."""
    E, H = wq.shape
    pad = ((0, 0), (0, _HP - H))
    parts = [jnp.pad(w, pad) if H != _HP else w for w in (wq, wk, wv)]
    return jnp.concatenate(parts, axis=1).astype(jnp.bfloat16)   # (E, 3*Hp)


def self_attention(x, w_qkv, head_size, *, q_tile=128):
    """x: (B, T, E); w_qkv: (E, 3*128) bf16 from build_qkv_weight."""
    B, T, E = x.shape
    q_tile = min(q_tile, T)
    assert T % q_tile == 0, "context length must be divisible by the q tile"

    x_bf16 = x.astype(jnp.bfloat16)        # halves x DMA bytes into the kernel

    kernel = functools.partial(self_attention_kernel,
                               head_size=head_size, q_tile=q_tile)

    out_padded = pl.pallas_call(
        kernel,
        out_shape=jax.ShapeDtypeStruct((B, T, _HP), x.dtype),
        grid_spec=pltpu.PrefetchScalarGridSpec(
            num_scalar_prefetch=0,
            grid=(B, T // q_tile),
            in_specs=[
                # Full sequence per batch (same block across q-tiles -> DMA'd
                # once per batch, resident while the q-tiles iterate).
                pl.BlockSpec((1, T, E), lambda b, i: (b, 0, 0)),
                # Grid-invariant fused weight; VMEM is nowhere near tight at
                # these shapes, so default double-buffering is left alone
                # (use pipeline_mode=pl.Buffered(1) on a VMEM-tight tiling).
                pl.BlockSpec((E, 3 * _HP), lambda b, i: (0, 0)),
            ],
            out_specs=pl.BlockSpec((1, q_tile, _HP), lambda b, i: (b, i, 0)),
        ),
        compiler_params=pltpu.CompilerParams(
            dimension_semantics=("parallel", "parallel")),
    )(x_bf16, w_qkv)

    # Drop the lane padding; downstream consumers could keep the Hp layout.
    return out_padded[..., :head_size]


def self_attention_ref(x, wq, wk, wv):
    q = x @ wq
    k = x @ wk
    v = x @ wv
    s = (q @ jnp.swapaxes(k, -2, -1)) * (k.shape[-1] ** -0.5)
    T = x.shape[1]
    mask = jnp.tril(jnp.ones((T, T), dtype=bool))
    s = jnp.where(mask, s, -jnp.inf)
    w = jax.nn.softmax(s, axis=-1)
    return w @ v


if __name__ == "__main__":
    # Shapes consistent with the module: context_len=256, embed_size=384, a
    # typical head_size of 64; small batch for the test.
    B, T, E, H = 2, 256, 384, 64

    key = jax.random.PRNGKey(0)
    kx, kq, kk, kv = jax.random.split(key, 4)

    x = jax.random.normal(kx, (B, T, E), dtype=jnp.float32)
    # nn.Linear(embed_size, head_size, bias=False) weight is (H, E); we store
    # the transpose (E, H) so the kernel computes x @ W directly.
    wq = jax.random.normal(kq, (E, H), dtype=jnp.float32) * (E ** -0.5)
    wk = jax.random.normal(kk, (E, H), dtype=jnp.float32) * (E ** -0.5)
    wv = jax.random.normal(kv, (E, H), dtype=jnp.float32) * (E ** -0.5)

    # Init-time fused/padded bf16 weight (hoisted out of the per-call path).
    w_qkv = build_qkv_weight(wq, wk, wv)

    out = self_attention(x, w_qkv, H)
    out = jax.block_until_ready(out)

    ref = self_attention_ref(x, wq, wk, wv)
    assert out.shape == (B, T, H)
    # Tolerance accounts for bf16 rounding of x / weights / probs (accumulation
    # stays f32) plus pl.reciprocal(approx=True) in the softmax normalizer.
    assert jnp.allclose(out, ref, atol=5e-2, rtol=5e-2), "mismatch vs reference"

    print("KERNEL_OK")
</pallas_src>

<mosaic_0001>
module attributes {stable_mosaic.version = 11 : i64} {
  func.func @self_attention_kernel(%arg0: i32, %arg1: i32, %arg2: memref<1x256x384xbf16, #tpu.memory_space<vmem>>, %arg3: memref<384x384xbf16, #tpu.memory_space<vmem>>, %arg4: memref<1x128x128xf32, #tpu.memory_space<vmem>>) attributes {dimension_semantics = [#tpu.dimension_semantics<parallel>, #tpu.dimension_semantics<parallel>], iteration_bounds = array<i64: 2, 2>, scalar_prefetch = 0 : i64, scratch_operands = 0 : i64, tpu.core_type = #tpu.core_type<tc>, window_params = [{transform_indices = @transform_0, window_bounds = array<i64: 1, 256, 384>}, {pipeline_mode = #tpu.pipeline_mode<synchronous>, transform_indices = @transform_1, window_bounds = array<i64: 384, 384>}, {transform_indices = @transform_2, window_bounds = array<i64: 1, 128, 128>}]} {
    %c0 = arith.constant 0 : index
    %c0_0 = arith.constant 0 : index
    %c0_1 = arith.constant 0 : index
    %0 = vector.load %arg2[%c0, %c0_0, %c0_1] : memref<1x256x384xbf16, #tpu.memory_space<vmem>>, vector<1x256x384xbf16>
    %1 = vector.shape_cast %0 : vector<1x256x384xbf16> to vector<256x384xbf16>
    %c128_i32 = arith.constant 128 : i32
    %2 = arith.muli %arg1, %c128_i32 : i32
    %3 = tpu.assume_multiple %2, 128 : i32
    %c0_2 = arith.constant 0 : index
    %4 = arith.index_cast %3 : i32 to index
    %c0_3 = arith.constant 0 : index
    %5 = vector.load %arg2[%c0_2, %4, %c0_3] : memref<1x256x384xbf16, #tpu.memory_space<vmem>>, vector<1x128x384xbf16>
    %6 = vector.shape_cast %5 : vector<1x128x384xbf16> to vector<128x384xbf16>
    %c0_4 = arith.constant 0 : index
    %c0_5 = arith.constant 0 : index
    %7 = vector.load %arg3[%c0_4, %c0_5] : memref<384x384xbf16, #tpu.memory_space<vmem>>, vector<384x128xbf16>
    %cst = arith.constant dense<0.000000e+00> : vector<128x128xf32>
    %8 = tpu.matmul %6, %7, %cst {dimension_numbers = #tpu.dot_dimension_numbers<[1], [0], [0], [1], [0, 0, 1, 1], [], []>} : vector<128x384xbf16>, vector<384x128xbf16>, vector<128x128xf32> -> vector<128x128xf32>
    %c0_6 = arith.constant 0 : index
    %c128 = arith.constant 128 : index
    %9 = vector.load %arg3[%c0_6, %c128] : memref<384x384xbf16, #tpu.memory_space<vmem>>, vector<384x256xbf16>
    %cst_7 = arith.constant dense<0.000000e+00> : vector<256x256xf32>
    %10 = tpu.matmul %1, %9, %cst_7 {dimension_numbers = #tpu.dot_dimension_numbers<[1], [0], [0], [1], [0, 0, 1, 1], [], []>} : vector<256x384xbf16>, vector<384x256xbf16>, vector<256x256xf32> -> vector<256x256xf32>
    %11 = vector.extract_strided_slice %10 {offsets = [0, 0], sizes = [256, 128], strides = [1, 1]} : vector<256x256xf32> to vector<256x128xf32>
    %12 = vector.extract_strided_slice %10 {offsets = [0, 128], sizes = [256, 128], strides = [1, 1]} : vector<256x256xf32> to vector<256x128xf32>
    %cst_8 = arith.constant 1.250000e-01 : f32
    %13 = vector.broadcast %cst_8 : f32 to vector<128x128xf32>
    %14 = arith.mulf %8, %13 : vector<128x128xf32>
    %15 = arith.truncf %14 : vector<128x128xf32> to vector<128x128xbf16>
    %16 = arith.truncf %11 : vector<256x128xf32> to vector<256x128xbf16>
    %17 = arith.truncf %12 : vector<256x128xf32> to vector<256x128xbf16>
    %cst_9 = arith.constant dense<0.000000e+00> : vector<128x256xf32>
    %18 = tpu.matmul %15, %16, %cst_9 {dimension_numbers = #tpu.dot_dimension_numbers<[1], [1], [0], [0], [0, 0, 1, 0], [], []>} : vector<128x128xbf16>, vector<256x128xbf16>, vector<128x256xf32> -> vector<128x256xf32>
    %19 = tpu.iota {dimensions = array<i32: 0>} : vector<128x256xi32>
    %c128_i32_10 = arith.constant 128 : i32
    %20 = arith.muli %arg1, %c128_i32_10 : i32
    %21 = vector.broadcast %20 : i32 to vector<128x256xi32>
    %22 = arith.addi %19, %21 : vector<128x256xi32>
    %23 = tpu.iota {dimensions = array<i32: 1>} : vector<128x256xi32>
    %24 = arith.cmpi sle, %23, %22 : vector<128x256xi32>
    %cst_11 = arith.constant 0xFF800000 : f32
    %25 = vector.broadcast %cst_11 : f32 to vector<128x256xf32>
    %26 = arith.select %24, %18, %25 : vector<128x256xi1>, vector<128x256xf32>
    %cst_12 = arith.constant dense<0xFF800000> : vector<128xf32>
    %27 = vector.multi_reduction <maximumf>, %26, %cst_12 [1] : vector<128x256xf32> to vector<128xf32>
    %28 = vector.shape_cast %27 : vector<128xf32> to vector<128x1xf32>
    %29 = vector.broadcast %28 : vector<128x1xf32> to vector<128x256xf32>
    %30 = arith.subf %26, %29 : vector<128x256xf32>
    %31 = math.exp %30 : vector<128x256xf32>
    %cst_13 = arith.constant dense<0.000000e+00> : vector<128xf32>
    %32 = vector.multi_reduction <add>, %31, %cst_13 [1] : vector<128x256xf32> to vector<128xf32>
    %33 = vector.shape_cast %32 : vector<128xf32> to vector<128x1xf32>
    %34 = arith.truncf %31 : vector<128x256xf32> to vector<128x256xbf16>
    %cst_14 = arith.constant dense<0.000000e+00> : vector<128x128xf32>
    %35 = tpu.matmul %34, %17, %cst_14 {dimension_numbers = #tpu.dot_dimension_numbers<[1], [0], [0], [1], [0, 0, 1, 1], [], []>} : vector<128x256xbf16>, vector<256x128xbf16>, vector<128x128xf32> -> vector<128x128xf32>
    %36 = tpu.reciprocal %33 {approx = true} : vector<128x1xf32> -> vector<128x1xf32>
    %37 = vector.broadcast %36 : vector<128x1xf32> to vector<128x128xf32>
    %38 = arith.mulf %35, %37 : vector<128x128xf32>
    %c0_15 = arith.constant 0 : index
    %c0_16 = arith.constant 0 : index
    %c0_17 = arith.constant 0 : index
    %39 = vector.load %arg4[%c0_15, %c0_16, %c0_17] : memref<1x128x128xf32, #tpu.memory_space<vmem>>, vector<1x128x128xf32>
    %40 = vector.shape_cast %39 : vector<1x128x128xf32> to vector<128x128xf32>
    %41 = vector.shape_cast %38 : vector<128x128xf32> to vector<1x128x128xf32>
    tpu.vector_store %arg4[%c0_15, %c0_16, %c0_17], %41 {strides = array<i32>} : memref<1x128x128xf32, #tpu.memory_space<vmem>>, vector<1x128x128xf32>,
    return
  }
  func.func @transform_0(%arg0: i32, %arg1: i32) -> (i32, i32, i32) {
    %c0_i32 = arith.constant 0 : i32
    %c0_i32_0 = arith.constant 0 : i32
    %c0_i32_1 = arith.constant 0 : i32
    return %arg0, %c0_i32, %c0_i32_0 : i32, i32, i32
  }
  func.func @transform_1(%arg0: i32, %arg1: i32) -> (i32, i32) {
    %c0_i32 = arith.constant 0 : i32
    %c0_i32_0 = arith.constant 0 : i32
    %c0_i32_1 = arith.constant 0 : i32
    return %c0_i32, %c0_i32_0 : i32, i32
  }
  func.func @transform_2(%arg0: i32, %arg1: i32) -> (i32, i32, i32) {
    %c0_i32 = arith.constant 0 : i32
    %c0_i32_0 = arith.constant 0 : i32
    return %arg0, %arg1, %c0_i32 : i32, i32, i32
  }
}

</mosaic_0001>

<bundles_post_ra>
// kernel: tpu_custom_call.1
= control target key start
LH: loop header
LB: loop body
LE: loop exit
PB: predicated region body
PF: predicated region fallthrough
CT: control target
= control target key end

     0   :  { %s4391_s0 = inlined_call_operand.hbm [shape: bf16[2,256,384], index: 0, kind: input, shape index: {}]   ;;  %s4392_s1 = inlined_call_operand.hbm [shape: bf16[384,384], index: 1, kind: input, shape index: {}]   ;;  %s4393_s2 = inlined_call_operand.hbm [shape: f32[2,256,128], index: 2, kind: output, shape index: {}]  }
   0x1   :  { %4405 = sst [smem:[#allocation15_spill]] %s4392_s1 }
   0x2   :  { %7 = vsyncpa [#allocation3], 0 }
   0x3   :  { %9 = vsyncpa [#allocation3 + $0x1], 0 }
   0x4   :  { %10 = vsyncpa [#allocation6], 0 }
   0x5   :  { %11 = vsyncpa [#allocation4], 0 }
   0x6   :  { %13 = vsyncpa [#allocation4 + $0x1], 0  ;;  %s3545_s9 = smov 0   ;;  %s3547_s10 = smov 0  }
   0x7   :  { %s3549_s11 = smov 0   ;;  %s3551_s12 = smov 0  }
   0x8   :  { %s3553_s13 = smov 0   ;;  %s3555_s14 = smov 0  }
   0x9   :  { %s3557_s15 = smov 0   ;;  %s3559_s16 = smov 0  }
   0xa   :  { %s3561_s17 = smov 0   ;;  %s3563_s18 = smov 0  }
   0xb   :  { %s3565_s19 = smov 0  }
   0xc LB: > { %4406 = sst [smem:[#allocation11_spill]] %s3512_s17  ;;  %s2477_s20 = sadd.s32 4294967295, %s3520_s19   ;;  %s3520_s19 = sphi %s3565_s19, %s19_s19   ;;  %s3516_s18 = sphi %s3563_s18, %s4446_s18   ;;  %s3512_s17 = sphi %s3561_s17, %s4437_s17   ;;  %s3508_s16 = sphi %s3559_s16, %s4445_s16   ;;  %s3504_s15 = sphi %s3557_s15, %s4436_s15   ;;  %s3500_s14 = sphi %s3555_s14, %s4444_s14   ;;  %s3496_s13 = sphi %s3553_s13, %s4443_s13   ;;  %s3492_s12 = sphi %s3551_s12, %s4442_s12   ;;  %s3488_s11 = sphi %s3549_s11, %s4441_s11   ;;  %s3484_s10 = sphi %s3547_s10, %s4440_s10   ;;  %s3480_s9 = sphi %s3545_s9, %s4439_s9  }
   0xd   : > { %s2478_s21 = sadd.s32 4294967294, %s3520_s19   ;;  %p51_p0 = scmp.ne.s32.totalorder %s3496_s13, %s3492_s12 }
   0xe   : > { %p3601_p1 = scmp.eq.s32.totalorder %s2477_s20, 0  ;;  %s87_s23 = sadd.s32 1, %s3488_s11 }
   0xf   : > { %p97_p2 = scmp.ne.s32.totalorder %s3488_s11, %s3484_s10  ;;  %p98_p4 = scmp.eq.s32.totalorder %s2477_s20, 3 }
  0x10   : > { %s4407_s22 = scalar_select %p3601_p1, 1, 0 }
  0x11   : > { %p3610_p3 = por %p3601_p1, %p51_p0  ;;  %p103_p5 = scmp.ne.s32.totalorder %s3484_s10, %s3480_s9 }
  0x12   : > { %p104_p6 = scmp.eq.s32.totalorder %s2478_s21, 3  ;;  %p3616_p7 = por %p98_p4, %p97_p2 }
  0x13   : > { %s4408_s24 = scalar_select %p3610_p3, 1, 0 }
  0x14   : > { %s4409_s25 = scalar_select %p3616_p7, 1, 0 }
  0x15   : > { %p2479_p8 = scmp.ge.s32.totalorder %s3520_s19, 1  ;;  %p3621_p9 = por %p104_p6, %p103_p5 }
  0x16   : > { %p111_p10 = scmp.lt.s32.totalorder %s3520_s19, 5  ;;  %s3522_s28 = smov [#allocation5]  }
  0x17   : > { %s4410_s26 = scalar_select %p3621_p9, 1, 0 }
  0x18   : > { %p3626_p11 = pnand %p2479_p8, %p111_p10  ;;  %s123_s29 = sshll.u32 %s3522_s28, 4  ;;  %s124_s29 = int_to_ptr.vmem [resolvable:$true] %s123_s29 }
  0x19   : > { %4411 = sst [smem:[#allocation12_spill]] %s4410_s26  ;;  %s4414_s1 = sld [smem:[#allocation15_spill]] }
  0x1a   : > { %s4412_s27 = scalar_select %p3626_p11, 1, 0 }
  0x1b   : > { %p2938_p12 = pneg %p3626_p11 }
  0x1d   : > { %p3634_p13 = pnand %p2938_p12, %p3601_p1 }
  0x1f   : > { %s3336_s5 = scalar_lea.hbm %s4414_s1, 9216  ;;  %p3338_p2 = pneg %p3634_p13 }
  0x20   : > { %p3337_p0 = scmp.ne.s32.totalorder %s4414_s1, %s3336_s5  ;;  %p3343_p6 = scmp.lt.u32.totalorder %s3336_s5, %s4414_s1 }
  0x22   : > { %p3339_p4 = pnand %p3338_p2, %p3337_p0 }
  0x24   : > { %p3340_p5 = pneg %p3339_p4 }
  0x26   : > { %p3345_p8 = pnand %p3343_p6, %p3340_p5 }
  0x28   : > { %3348 = shalt.err (!%p3345_p8)
}
  0x29   : > { %s3349_s20 = scalar_lea.vmem %s124_s29, 9216  ;;  %p3357_p7 = scmp.lt.s32.totalorder %s124_s29, %s124_s29 }
  0x2a   : > { %p3350_p10 = scmp.ne.s32.totalorder %s124_s29, %s3349_s20  ;;  %p3358_p1 = scmp.lt.s32.totalorder %s3349_s20, %s3349_s20 }
  0x2c   : > { %p3352_p12 = pnand %p3350_p10, %p3338_p2  ;;  %p3359_p3 = por %p3358_p1, %p3357_p7 }
  0x2e   : > { %p3353_p9 = pneg %p3352_p12 }
  0x30   : > { %p3360_p11 = pnand %p3359_p3, %p3353_p9 }
  0x32   : > { %3363 = shalt.err (!%p3360_p11)
}
  0x33   : > { %s4399_s21 = smov 192   ;;  %s4400_s28 = smov 12  }
  0x34   : > { %2941 = dma.hbm_to_vmem [thread:$0]  (!%p3634_p13), %s4414_s1, 9216, %s124_s29, [#allocation6], %s4399_s21, %s4399_s21, %s4400_s28  }
  0x35   : > { %s28_s5 = sadd.s32 1, %s3512_s17  ;;  %s31_s6 = sadd.s32 1, %s3516_s18 }
  0x36   : > { %p29_p1 = scmp.ge.s32.totalorder %s28_s5, 2  ;;  %s38_s7 = sadd.s32 1, %s3500_s14 }
  0x37   : > { %p45_p3 = scmp.ne.s32.totalorder %s3500_s14, %s3496_s13  ;;  %p46_p7 = scmp.eq.s32.totalorder %s3520_s19, 0 }
  0x38   : > { %s4448_s5 = smov (%p29_p1, %s28_s5), 0  ;;  %s4450_s6 = smov (!%p29_p1, %s31_s6), %s3516_s18 }
  0x39   : > { %4415 = sst [smem:[#allocation13_spill]] %s4448_s5  ;;  %s83_s30 = ssub.s32 %s3512_s17, %s4448_s5 }
  0x3a   : > { %p33_p9 = scmp.ge.s32.totalorder %s4450_s6, 2  ;;  %p2951_p11 = scmp.lt.s32.totalorder %s3520_s19, 4 }
  0x3b   : > { %p3669_p13 = por %p46_p7, %p45_p3  ;;  %s137_s8 = sand.u32 1, %s3500_s14  }
  0x3c   : > { %s4452_s6 = smov (%p33_p9, %s4450_s6), 0  ;;  %s2927_s12 = smul.u32 384, %s137_s8 }
  0x3d   : > { %4417 = sst [smem:[#allocation14_spill]] %s4452_s6  ;;  %s35_s20 = ssub.s32 %s3516_s18, %s4452_s6 }
  0x3e   : > { %s2928_s3 = smul.u32 6144, %s3516_s18  ;;  %p36_p0 = scmp.eq.s32.totalorder %s35_s20, 0 }
  0x3f   : > { %s84_s4 = sor.u32 %s83_s30, %s35_s20  ;;  %s141_s26 = scalar_lea.vmem [#allocation2], %s2927_s12 }
  0x40   : > { %p85_p2 = scmp.eq.s32.totalorder %s84_s4, 0  ;;  %s3690_s17 = scalar_lea.hbm %s4391_s0, %s2928_s3 }
  0x41   : > { %s3680_s21 = scalar_select %p36_p0, %s3500_s14, %s38_s7  }
  0x42   : > { %s3685_s28 = scalar_select %p85_p2, %s3488_s11, %s87_s23  }
  0x43   : > { %s148_s6 = sshll.u32 %s141_s26, 4  ;;  %p3698_p4 = pnand %p2951_p11, %p3669_p13  ;;  %s3692_s6 = int_to_ptr.vmem [resolvable:$true] %s148_s6 }
  0x44   : > { %s3702_s23 = scalar_lea.sflag [#allocation3], %s137_s8  ;;  %s3364_s1 = scalar_lea.hbm %s3690_s17, 6144 }
  0x45   : > { %p3365_p5 = scmp.ne.s32.totalorder %s3690_s17, %s3364_s1  ;;  %p3366_p6 = pneg %p3698_p4 }
  0x46   : > { %s3369_s30 = scalar_lea.hbm %s4391_s0, 12288  ;;  %p3370_p12 = scmp.lt.u32.totalorder %s3690_s17, %s4391_s0 }
  0x47   : > { %p3367_p8 = pnand %p3366_p6, %p3365_p5  ;;  %p3371_p1 = scmp.lt.u32.totalorder %s3369_s30, %s3364_s1 }
  0x48   : > { %p3373_p7 = scmp.lt.u32.totalorder %s3364_s1, %s3690_s17 }
  0x49   : > { %p3368_p10 = pneg %p3367_p8  ;;  %p3372_p3 = por %p3371_p1, %p3370_p12 }
  0x4b   : > { %p3374_p9 = por %p3373_p7, %p3372_p3 }
  0x4d   : > { %p3375_p11 = pnand %p3374_p9, %p3368_p10 }
  0x4f   : > { %3378 = shalt.err (!%p3375_p11)
}
  0x50   : > { %s3379_s8 = scalar_lea.vmem %s3692_s6, 6144  ;;  %s3525_s20 = smov [#allocation2]  }
  0x51   : > { %p3380_p13 = scmp.ne.s32.totalorder %s3692_s6, %s3379_s8  ;;  %s3384_s3 = sshll.u32 %s3525_s20, 4  ;;  %s3385_s3 = int_to_ptr.vmem [resolvable:$false] %s3384_s3 }
  0x52   : > { %s3386_s4 = scalar_lea.vmem %s3385_s3, 12288  ;;  %p3387_p5 = scmp.lt.s32.totalorder %s3692_s6, %s3385_s3 }
  0x53   : > { %p3382_p0 = pnand %p3380_p13, %p3366_p6  ;;  %p3388_p8 = scmp.lt.s32.totalorder %s3386_s4, %s3379_s8 }
  0x55   : > { %p3383_p2 = pneg %p3382_p0  ;;  %p3389_p12 = por %p3388_p8, %p3387_p5 }
  0x57   : > { %p3390_p1 = pnand %p3389_p12, %p3383_p2 }
  0x59   : > { %3393 = shalt.err (!%p3390_p1)
}
  0x5a   : > { %s4419_s1 = smov 12   ;;  %s4420_s26 = smov 192  }
  0x5b   : > { %2945 = dma.hbm_to_vmem [thread:$0]  (!%p3698_p4), %s3690_s17, 6144, %s3692_s6, %s3702_s23, %s4420_s26, %s4420_s26, %s4419_s1  }
  0x5c   : > { %p4421_p6 = scmp.ne.s32.totalorder %s4412_s27, 0 }
  0x5d   : > { %s162_s5 = sand.u32 (!%p4421_p6), 1, %s3496_s13   ;;  %p4422_p10 = scmp.ne.s32.totalorder (!%p4421_p6), %s4408_s24, 0 }
  0x5e   : > { %160 = sbr.rel (%p4421_p6) target bundleno = 1281 (0x501), region = 28  ;;  %s163_s29 = scalar_lea.sflag (!%p4421_p6), [#allocation3], %s162_s5 }
  0x5f   : > { %s2929_s30 = smul.u32 (!%p4421_p6), 384, %s162_s5 }
  0x61   : > { %s3736_s12 = scalar_lea.vmem (!%p4421_p6), [#allocation2], %s2929_s30 }
  0x65   : > { %3467 = dma.done.wait (%p4422_p10), %s163_s29, 6144  }
  0x66   : > { %3469 = vsyncadd (%p4422_p10), %s163_s29, 4294961152  ;;  %p4423_p3 = scmp.ne.s32.totalorder %s4407_s22, 0 }
  0x68   : > { %3471 = dma.done.wait (%p4423_p3), [#allocation6], 9216  }
  0x69   : > { %3473 = vsyncadd (%p4423_p3), [#allocation6], 4294958080  ;;  %s2486_s17 = sshll.u32 %s3504_s15, 7  ;;  %v3048_v0 = vld [vmem:[#allocation5 + $0xc0] ss:$12 sps:$4 sm:$0xff]   ;;  %v3526_v59 = vmov 0  }
  0x6a   : > { %v3049_v1 = vld [vmem:[#allocation5] ss:$12 sps:$4 sm:$0xff]   ;;  %2639 = vmatprep.subr.bf16.mxu0 %v3048_v0  ;;  %v3051_v3 = vld [vmem:[#allocation5 + $0xd8] ss:$12 sps:$4 sm:$0xff]   ;;  %v3054_v6 = vld [vmem:[#allocation5 + $0xf0] ss:$12 sps:$4 sm:$0xff]  }
  0x6b   : > { %v3050_v2 = vld [vmem:[#allocation5 + $0x180] ss:$12 sps:$4 sm:$0xff]   ;;  %2640 = vmatpush3.bf16.msra.mxu0 %v3049_v1  ;;  %v3052_v4 = vld [vmem:[#allocation5 + $0x18] ss:$12 sps:$4 sm:$0xff]   ;;  %v3055_v7 = vld [vmem:[#allocation5 + $0x30] ss:$12 sps:$4 sm:$0xff]  }
  0x6c   : > { %2815 = vmatprep.subr.bf16.mxu1 %v3050_v2  ;;  %2641 = vmatprep.subr.bf16.mxu0 %v3051_v3  ;;  %v3053_v5 = vld [vmem:[#allocation5 + $0x198] ss:$12 sps:$4 sm:$0xff]   ;;  %v3056_v8 = vld [vmem:[#allocation5 + $0x1b0] ss:$12 sps:$4 sm:$0xff]   ;;  %v3057_v9 = vld [vmem:[#allocation5 + $0x108] ss:$12 sps:$4 sm:$0xff]  }
  0x6d   : > { %2816 = vmatpush3.bf16.msra.mxu1 %v3050_v2  ;;  %v3058_v10 = vld [vmem:[#allocation5 + $0x48] ss:$12 sps:$4 sm:$0xff]   ;;  %v3060_v12 = vld [vmem:[#allocation5 + $0x120] ss:$12 sps:$4 sm:$0xff]   ;;  %s258_s22 = sshra.s32 %s2486_s17, 3  ;;  %s188_s6 = sand.u32 1, %s3484_s10  }
  0x6e   : > { %2817 = vmatprep.subr.bf16.mxu1 %v3053_v5  ;;  %v3059_v11 = vld [vmem:[#allocation5 + $0x1c8] ss:$12 sps:$4 sm:$0xff]   ;;  %v3062_v13 = vld [vmem:[#allocation5 + $0x1e0] ss:$12 sps:$4 sm:$0xff]   ;;  %v3063_v15 = vld [vmem:[#allocation5 + $0x138] ss:$12 sps:$4 sm:$0xff]  }
  0x6f   : > { %2642 = vmatpush3.bf16.msra.mxu0 %v3052_v4  ;;  %v3061_v14 = vld [vmem:[#allocation5 + $0x60] ss:$12 sps:$4 sm:$0xff]   ;;  %s2638_s24 = smul.u32 12, %s258_s22  ;;  %v3065_v16 = vld [vmem:[#allocation5 + $0x1f8] ss:$12 sps:$4 sm:$0xff]   ;;  %s2485_s7 = sshll.u32 %s188_s6, 7 }
  0x70   : > { %2643 = vmatprep.subr.bf16.mxu0 %v3054_v6  ;;  %v3064_v17 = vld [vmem:[#allocation5 + $0x78] ss:$12 sps:$4 sm:$0xff]   ;;  %v3066_v18 = vld [vmem:[#allocation5 + $0x150] ss:$12 sps:$4 sm:$0xff]   ;;  %v3069_v21 = vld [vmem:[#allocation5 + $0x168] ss:$12 sps:$4 sm:$0xff]  }
  0x71   : > { %2818 = vmatpush3.bf16.msra.mxu1 %v3053_v5  ;;  %v3068_v19 = vld [vmem:[#allocation5 + $0x210] ss:$12 sps:$4 sm:$0xff]   ;;  %s3750_s27 = scalar_lea.vmem %s3736_s12, %s2638_s24 [#allocation2]  ;;  %v3070_v23 = vld [vmem:[#allocation5 + $0xa8] ss:$12 sps:$4 sm:$0xff]   ;;  %v3082_v31 = vld [vmem:[#allocation5 + $0x20] ss:$12 sps:$4 sm:$0xff]  }
  0x72   : > { %2819 = vmatprep.subr.bf16.mxu1 %v3056_v8  ;;  %v3067_v20 = vld [vmem:[#allocation5 + $0x90] ss:$12 sps:$4 sm:$0xff]   ;;  %v3071_v24 = vld [vmem:[#allocation5 + $0x228] ss:$12 sps:$4 sm:$0xff]   ;;  %v3072_v27 = vld [vmem:[%s3750_s27] ss:$12 sps:$4 sm:$0xff]  }
  0x73   : > { %2644 = vmatpush3.bf16.msra.mxu0 %v3055_v7  ;;  %v3074_v22 = vld [vmem:[%s3750_s27 + $0x4] ss:$12 sps:$4 sm:$0xff]   ;;  %v3078_v25 = vld [vmem:[%s3750_s27 + $0x8] ss:$12 sps:$4 sm:$0xff]   ;;  %v3079_v30 = vld [vmem:[%s3750_s27 + $0x20] ss:$12 sps:$4 sm:$0xff]  }
  0x74   : > { %2645 = vmatprep.subr.bf16.mxu0 %v3057_v9  ;;  %647 = vmatprep.mubr.bf16.mxu0 %v3074_v22  ;;  %v3077_v26 = vld [vmem:[#allocation5 + $0x8] ss:$12 sps:$4 sm:$0xff]   ;;  %v3075_v28 = vld [vmem:[#allocation5 + $0x4] ss:$12 sps:$4 sm:$0xff]   ;;  %v3089_v40 = vld [vmem:[#allocation5 + $0x4c] ss:$12 sps:$4 sm:$0xff]  }
  0x75   : > { %2820 = vmatpush3.bf16.msra.mxu1 %v3056_v8  ;;  %2831 = vmatprep.mubr.bf16.mxu1 %v3078_v25  ;;  %v3083_v29 = vld [vmem:[%s3750_s27 + $0x1c] ss:$12 sps:$4 sm:$0xff]   ;;  %v3085_v33 = vld [vmem:[%s3750_s27 + $0x18] ss:$12 sps:$4 sm:$0xff]   ;;  %v3086_v36 = vld [vmem:[#allocation5 + $0x34] ss:$12 sps:$4 sm:$0xff]  }
  0x76   : > { %2821 = vmatprep.subr.bf16.mxu1 %v3059_v11  ;;  %v3080_v32 = vld [vmem:[#allocation5 + $0x1c] ss:$12 sps:$4 sm:$0xff]   ;;  %v3088_v34 = vld [vmem:[#allocation5 + $0x38] ss:$12 sps:$4 sm:$0xff]   ;;  %v3092_v38 = vld [vmem:[%s3750_s27 + $0x34] ss:$12 sps:$4 sm:$0xff]  }
  0x77   : > { %2646 = vmatpush3.bf16.msra.mxu0 %v3058_v10  ;;  %v3098_v35 = vld [vmem:[%s3750_s27 + $0x38] ss:$12 sps:$4 sm:$0xff]   ;;  %v3091_v37 = vld [vmem:[#allocation5 + $0x50] ss:$12 sps:$4 sm:$0xff]   ;;  %v3097_v42 = vld [vmem:[#allocation5 + $0x68] ss:$12 sps:$4 sm:$0xff]  }
  0x78   : > { %2647 = vmatprep.subr.bf16.mxu0 %v3060_v12  ;;  %v3099_v39 = vld [vmem:[%s3750_s27 + $0x50] ss:$12 sps:$4 sm:$0xff]   ;;  %v3102_v44 = vld [vmem:[#allocation5 + $0x80] ss:$12 sps:$4 sm:$0xff]   ;;  %v3118_v46 = vld [vmem:[%s3750_s27 + $0x68] ss:$12 sps:$4 sm:$0xff]  }
  0x79   : > { %2822 = vmatpush3.bf16.msra.mxu1 %v3059_v11  ;;  %v3094_v41 = vld [vmem:[%s3750_s27 + $0x30] ss:$12 sps:$4 sm:$0xff]   ;;  %v3103_v45 = vld [vmem:[%s3750_s27 + $0x4c] ss:$12 sps:$4 sm:$0xff]   ;;  %v3105_v50 = vld [vmem:[%s3750_s27 + $0x48] ss:$12 sps:$4 sm:$0xff]  }
  0x7a   : > { %2823 = vmatprep.subr.bf16.mxu1 %v3062_v13  ;;  %v3095_v43 = vld [vmem:[#allocation5 + $0x64] ss:$12 sps:$4 sm:$0xff]   ;;  %v3119_v47 = vld [vmem:[%s3750_s27 + $0x80] ss:$12 sps:$4 sm:$0xff]   ;;  %v3100_v48 = vld [vmem:[#allocation5 + $0x7c] ss:$12 sps:$4 sm:$0xff]  }
  0x7b   : > { %2648 = vmatpush3.bf16.msra.mxu0 %v3061_v14  ;;  %v3108_v49 = vld [vmem:[#allocation5 + $0x98] ss:$12 sps:$4 sm:$0xff]   ;;  %v3106_v51 = vld [vmem:[#allocation5 + $0x94] ss:$12 sps:$4 sm:$0xff]   ;;  %v3111_v53 = vld [vmem:[#allocation5 + $0xb0] ss:$12 sps:$4 sm:$0xff]  }
  0x7c   : > { %2649 = vmatprep.subr.bf16.mxu0 %v3063_v15  ;;  %v3112_v52 = vld [vmem:[%s3750_s27 + $0x64] ss:$12 sps:$4 sm:$0xff]   ;;  %v3109_v56 = vld [vmem:[#allocation5 + $0xac] ss:$12 sps:$4 sm:$0xff]   ;;  %v3117_v57 = vld [vmem:[#allocation5 + $0xc8] ss:$12 sps:$4 sm:$0xff]  }
  0x7d   : > { %2824 = vmatpush3.bf16.msra.mxu1 %v3062_v13  ;;  %v3138_v54 = vld [vmem:[%s3750_s27 + $0x98] ss:$12 sps:$4 sm:$0xff]   ;;  %v3139_v55 = vld [vmem:[%s3750_s27 + $0xb0] ss:$12 sps:$4 sm:$0xff]   ;;  %v3114_v58 = vld [vmem:[%s3750_s27 + $0x60] ss:$12 sps:$4 sm:$0xff]  }
  0x7e   : > { %2825 = vmatprep.subr.bf16.mxu1 %v3065_v16  ;;  %v3115_v60 = vld [vmem:[#allocation5 + $0xc4] ss:$12 sps:$4 sm:$0xff]   ;;  %v3123_v61 = vld [vmem:[%s3750_s27 + $0x7c] ss:$12 sps:$4 sm:$0xff]   ;;  %v3122_v62 = vld [vmem:[#allocation5 + $0xe0] ss:$12 sps:$4 sm:$0xff]  }
  0x7f   : > { %2650 = vmatpush3.bf16.msra.mxu0 %v3064_v17  ;;  %v3120_v63 = vld [vmem:[#allocation5 + $0xdc] ss:$12 sps:$4 sm:$0xff]   ;;  %v3128_v0 = vld [vmem:[#allocation5 + $0xf8] ss:$12 sps:$4 sm:$0xff]   ;;  %v3126_v4 = vld [vmem:[#allocation5 + $0xf4] ss:$12 sps:$4 sm:$0xff]  }
  0x80   : > { %2651 = vmatprep.subr.bf16.mxu0 %v3066_v18  ;;  %v3125_v1 = vld [vmem:[%s3750_s27 + $0x78] ss:$12 sps:$4 sm:$0xff]   ;;  %v3775_v3 = vld [vmem:[#allocation5 + $0x188] ss:$12 sps:$4 sm:$0xff]   ;;  %v3777_v5 = vld [vmem:[#allocation5 + $0x1a0] ss:$12 sps:$4 sm:$0xff]  }
  0x81   : > { %2826 = vmatpush3.bf16.msra.mxu1 %v3065_v16  ;;  %v3773_v2 = vld [vmem:[#allocation5 + $0x184] ss:$12 sps:$4 sm:$0xff]   ;;  %v3132_v7 = vld [vmem:[%s3750_s27 + $0x94] ss:$12 sps:$4 sm:$0xff]   ;;  %v3782_v8 = vld [vmem:[#allocation5 + $0x19c] ss:$12 sps:$4 sm:$0xff]  }
  0x82   : > { %2827 = vmatprep.subr.bf16.mxu1 %v3068_v19  ;;  %v3131_v6 = vld [vmem:[#allocation5 + $0x110] ss:$12 sps:$4 sm:$0xff]   ;;  %v3785_v9 = vld [vmem:[#allocation5 + $0x1b8] ss:$12 sps:$4 sm:$0xff]   ;;  %v3137_v11 = vld [vmem:[#allocation5 + $0x128] ss:$12 sps:$4 sm:$0xff]  }
  0x83   : > { %2652 = vmatpush3.bf16.msra.mxu0 %v3067_v20  ;;  %v3129_v10 = vld [vmem:[#allocation5 + $0x10c] ss:$12 sps:$4 sm:$0xff]   ;;  %v3170_v12 = vld [vmem:[#allocation5 + $0x1b4] ss:$12 sps:$4 sm:$0xff]   ;;  %v3789_v13 = vld [vmem:[#allocation5 + $0x1d0] ss:$12 sps:$4 sm:$0xff]  }
  0x84   : > { %2653 = vmatprep.subr.bf16.mxu0 %v3069_v21  ;;  %v3134_v14 = vld [vmem:[%s3750_s27 + $0x90] ss:$12 sps:$4 sm:$0xff]   ;;  %v3142_v16 = vld [vmem:[#allocation5 + $0x140] ss:$12 sps:$4 sm:$0xff]   ;;  %v3148_v21 = vld [vmem:[#allocation5 + $0x158] ss:$12 sps:$4 sm:$0xff]  }
  0x85   : > { %2828 = vmatpush3.bf16.msra.mxu1 %v3068_v19  ;;  %v3135_v15 = vld [vmem:[#allocation5 + $0x124] ss:$12 sps:$4 sm:$0xff]   ;;  %v3143_v17 = vld [vmem:[%s3750_s27 + $0xac] ss:$12 sps:$4 sm:$0xff]   ;;  %v3181_v19 = vld [vmem:[#allocation5 + $0x1e8] ss:$12 sps:$4 sm:$0xff]  }
  0x86   : > { %2829 = vmatprep.subr.bf16.mxu1 %v3071_v24  ;;  %v3173_v18 = vld [vmem:[#allocation5 + $0x1cc] ss:$12 sps:$4 sm:$0xff]   ;;  %v3140_v20 = vld [vmem:[#allocation5 + $0x13c] ss:$12 sps:$4 sm:$0xff]   ;;  %v3146_v25 = vld [vmem:[#allocation5 + $0x154] ss:$12 sps:$4 sm:$0xff]  }
  0x87   : > { %2654 = vmatpush3.bf16.msra.mxu0 %v3070_v23  ;;  %v3145_v22 = vld [vmem:[%s3750_s27 + $0xa8] ss:$12 sps:$4 sm:$0xff]   ;;  %v3179_v23 = vld [vmem:[#allocation5 + $0x1e4] ss:$12 sps:$4 sm:$0xff]   ;;  %s4300_s23 = scalar_lea.vmem [#allocation7], %s2485_s7  ;;  %s2633_s8 = sshll.u32 %s3504_s15, 4 }
  0x88   : > { %1353 = vmatprep.subr.bf16.mxu0 %v3077_v26  ;;  %v3154_v26 = vld [vmem:[%s3736_s12 + $0x4] ss:$12 sps:$4 sm:$0xff]   ;;  %s2634_s20 = sshll.u32 %s3508_s16, 5  ;;  %s2378_s1 = sshll.u32 %s4300_s23, 4  ;;  %s4324_s1 = int_to_ptr.vmem [resolvable:$true] %s2378_s1 }
  0x89   : > { %2830 = vmatpush3.bf16.msra.mxu1 %v3071_v24  ;;  %v3184_v24 = vld [vmem:[#allocation5 + $0x200] ss:$12 sps:$4 sm:$0xff]   ;;  %s2375_s3 = sadd.s32 %s2634_s20, %s2633_s8  ;;  %s4330_s5 = scalar_lea.sflag [#allocation4], %s188_s6 }
  0x8a   : > { %648 = vmatmul.mubr.bf16.vlgmr.msra.gmra.mrb[0].mxu0 %v3072_v27  ;;  %2847 = vmatprep.subr.bf16.mxu1 %v3775_v3  ;;  %v3151_v27 = vld [vmem:[#allocation5 + $0x170] ss:$12 sps:$4 sm:$0xff]   ;;  %s2635_s4 = sshll.u32 %s2375_s3, 7  ;;  %s3394_s30 = scalar_lea.vmem %s4324_s1, 2048 }
  0x8b   : > { %1354 = vmatpush1.bf16.msra.mxu0 %v3075_v28  ;;  %655 = vmatprep.mubr.bf16.mxu0 %v3083_v29  ;;  %v3182_v28 = vld [vmem:[#allocation5 + $0x1fc] ss:$12 sps:$4 sm:$0xff]   ;;  %v3190_v29 = vld [vmem:[#allocation5 + $0x218] ss:$12 sps:$4 sm:$0xff]   ;;  %s4322_s26 = scalar_lea.hbm %s4393_s2, %s2635_s4  ;;  %p3395_p4 = scmp.ne.s32.totalorder %s4324_s1, %s3394_s30 }
  0x8c   : > { %2832 = vmatmul.mubr.bf16.vlgmr.msra.gmra.mrb[0].mxu1 %v3079_v30  ;;  %1355 = vmatprep.subr.bf16.mxu0 %v3082_v31  ;;  %v3149_v30 = vld [vmem:[#allocation5 + $0x16c] ss:$12 sps:$4 sm:$0xff]   ;;  %v3188_v31 = vld [vmem:[#allocation5 + $0x214] ss:$12 sps:$4 sm:$0xff]   ;;  %p4433_p7 = scmp.ne.s32.totalorder %s4409_s25, 0  ;;  %s3527_s29 = smov [#allocation7]  }
  0x8d   : > { %2835 = vmatprep.mubr.bf16.mxu1 %v3098_v35  ;;  %2855 = vmatpush1.bf16.msra.mxu1 %v3773_v2  ;;  %v3191_v35 = vld [vmem:[#allocation5 + $0x22c] ss:$12 sps:$4 sm:$0xff]  }
  0x8e   : > { %2848 = vmatprep.subr.bf16.mxu1 %v3777_v5  ;;  %p3396_p9 = pnand %p3395_p4, %p4433_p7 }
  0x8f   : > { %1356 = vmatpush1.bf16.msra.mxu0 %v3080_v32  ;;  %v3193_v32 = vld [vmem:[#allocation5 + $0x230] ss:$12 sps:$4 sm:$0xff]  }
  0x90   : > { %1357 = vmatprep.subr.bf16.mxu0 %v3088_v34  ;;  %v3155_v34 = vld [vmem:[%s3736_s12 + $0x1c] ss:$12 sps:$4 sm:$0xff]   ;;  %p3397_p11 = pneg %p3396_p9 }
  0x91   : > { %2856 = vmatpush1.bf16.msra.mxu1 %v3782_v8 }
  0x92   : > { %656 = vmatmul.mubr.bf16.gmra.mrb[4].mxu0 %v3085_v33  ;;  %2849 = vmatprep.subr.bf16.mxu1 %v3785_v9  ;;  %v3152_v33 = vld [vmem:[%s3736_s12] ss:$12 sps:$4 sm:$0xff]  }
  0x93   : > { %1358 = vmatpush1.bf16.msra.mxu0 %v3086_v36  ;;  %663 = vmatprep.mubr.bf16.mxu0 %v3092_v38  ;;  %v3197_v36 = vld [vmem:[%s3736_s12 + $0x98] ss:$12 sps:$4 sm:$0xff]   ;;  %v3158_v38 = vld [vmem:[%s3736_s12 + $0x34] ss:$12 sps:$4 sm:$0xff]  }
  0x94   : > { %1359 = vmatprep.subr.bf16.mxu0 %v3091_v37  ;;  %2836 = vmatmul.mubr.bf16.gmra.mrb[4].mxu1 %v3099_v39  ;;  %v3157_v37 = vld [vmem:[%s3736_s12 + $0x18] ss:$12 sps:$4 sm:$0xff]   ;;  %v3201_v39 = vld [vmem:[%s3736_s12 + $0xb0] ss:$12 sps:$4 sm:$0xff]  }
  0x95   : > { %2839 = vmatprep.mubr.bf16.mxu1 %v3118_v46  ;;  %2857 = vmatpush1.bf16.msra.mxu1 %v3170_v12  ;;  %v3178_v46 = vld [vmem:[%s3736_s12 + $0x60] ss:$12 sps:$4 sm:$0xff]  }
  0x96   : > { %2850 = vmatprep.subr.bf16.mxu1 %v3789_v13 }
  0x97   : > { %1360 = vmatpush1.bf16.msra.mxu0 %v3089_v40  ;;  %v3160_v40 = vld [vmem:[%s3736_s12 + $0x30] ss:$12 sps:$4 sm:$0xff]  }
  0x98   : > { %1361 = vmatprep.subr.bf16.mxu0 %v3097_v42  ;;  %v3205_v42 = vld [vmem:[%s3736_s12 + $0xc8] ss:$12 sps:$4 sm:$0xff]  }
  0x99   : > { %2858 = vmatpush1.bf16.msra.mxu1 %v3173_v18 }
  0x9a   : > { %664 = vmatmul.mubr.bf16.gmra.mrb[8].mxu0 %v3094_v41  ;;  %2851 = vmatprep.subr.bf16.mxu1 %v3181_v19  ;;  %v3167_v41 = vld [vmem:[%s3736_s12 + $0x4c] ss:$12 sps:$4 sm:$0xff]  }
  0x9b   : > { %1362 = vmatpush1.bf16.msra.mxu0 %v3095_v43  ;;  %671 = vmatprep.mubr.bf16.mxu0 %v3103_v45  ;;  %v3169_v43 = vld [vmem:[%s3736_s12 + $0x48] ss:$12 sps:$4 sm:$0xff]   ;;  %v3209_v45 = vld [vmem:[%s3736_s12 + $0xe0] ss:$12 sps:$4 sm:$0xff]  }
  0x9c   : > { %1363 = vmatprep.subr.bf16.mxu0 %v3102_v44  ;;  %2840 = vmatmul.mubr.bf16.gmra.mrb[8].mxu1 %v3119_v47  ;;  %v3176_v44 = vld [vmem:[%s3736_s12 + $0x64] ss:$12 sps:$4 sm:$0xff]   ;;  %v3185_v47 = vld [vmem:[%s3736_s12 + $0x7c] ss:$12 sps:$4 sm:$0xff]  }
  0x9d   : > { %2843 = vmatprep.mubr.bf16.mxu1 %v3138_v54  ;;  %2859 = vmatpush1.bf16.msra.mxu1 %v3179_v23  ;;  %v3221_v54 = vld [vmem:[%s3736_s12 + $0x128] ss:$12 sps:$4 sm:$0xff]  }
  0x9e   : > { %2852 = vmatprep.subr.bf16.mxu1 %v3184_v24 }
  0x9f   : > { %1364 = vmatpush1.bf16.msra.mxu0 %v3100_v48  ;;  %v3213_v48 = vld [vmem:[%s3736_s12 + $0xf8] ss:$12 sps:$4 sm:$0xff]  }
  0xa0   : > { %1365 = vmatprep.subr.bf16.mxu0 %v3108_v49  ;;  %v3187_v49 = vld [vmem:[%s3736_s12 + $0x78] ss:$12 sps:$4 sm:$0xff]  }
  0xa1   : > { %2860 = vmatpush1.bf16.msra.mxu1 %v3182_v28 }
  0xa2   : > { %672 = vmatmul.mubr.bf16.gmra.mrb[12].mxu0 %v3105_v50  ;;  %2853 = vmatprep.subr.bf16.mxu1 %v3190_v29  ;;  %v3194_v50 = vld [vmem:[%s3736_s12 + $0x94] ss:$12 sps:$4 sm:$0xff]  }
  0xa3   : > { %1366 = vmatpush1.bf16.msra.mxu0 %v3106_v51  ;;  %679 = vmatprep.mubr.bf16.mxu0 %v3112_v52  ;;  %v3217_v51 = vld [vmem:[%s3736_s12 + $0x110] ss:$12 sps:$4 sm:$0xff]  }
  0xa4   : > { %1367 = vmatprep.subr.bf16.mxu0 %v3111_v53  ;;  %2844 = vmatmul.mubr.bf16.gmra.mrb[12].mxu1 %v3139_v55  ;;  %v3196_v52 = vld [vmem:[%s3736_s12 + $0x90] ss:$12 sps:$4 sm:$0xff]   ;;  %v3198_v53 = vld [vmem:[%s3736_s12 + $0xac] ss:$12 sps:$4 sm:$0xff]   ;;  %v3200_v55 = vld [vmem:[%s3736_s12 + $0xa8] ss:$12 sps:$4 sm:$0xff]  }
  0xa5   : > { %1638 = vmatprep.mubr.bf16.mxu1 %v3526_v59  ;;  %2861 = vmatpush1.bf16.msra.mxu1 %v3188_v31 }
  0xa6   : > { %2854 = vmatprep.subr.bf16.mxu1 %v3193_v32 }
  0xa7   : > { %1368 = vmatpush1.bf16.msra.mxu0 %v3109_v56  ;;  %v3202_v56 = vld [vmem:[%s3736_s12 + $0xc4] ss:$12 sps:$4 sm:$0xff]  }
  0xa8   : > { %1369 = vmatprep.subr.bf16.mxu0 %v3117_v57  ;;  %v3225_v57 = vld [vmem:[%s3736_s12 + $0x140] ss:$12 sps:$4 sm:$0xff]  }
  0xa9   : > { %2862 = vmatpush1.bf16.msra.mxu1 %v3191_v35 }
  0xaa   : > { %680 = vmatmul.mubr.bf16.gmra.mrb[16].mxu0 %v3114_v58  ;;  %v3204_v58 = vld [vmem:[%s3736_s12 + $0xc0] ss:$12 sps:$4 sm:$0xff]  }
  0xab   : > { %1370 = vmatpush1.bf16.msra.mxu0 %v3115_v60  ;;  %687 = vmatprep.mubr.bf16.mxu0 %v3123_v61  ;;  %v3206_v60 = vld [vmem:[%s3736_s12 + $0xdc] ss:$12 sps:$4 sm:$0xff]   ;;  %v3229_v61 = vld [vmem:[%s3736_s12 + $0x158] ss:$12 sps:$4 sm:$0xff]  }
  0xac   : > { %1371 = vmatprep.subr.bf16.mxu0 %v3122_v62  ;;  %1639 = vmatmul.mubr.bf16.vlgmr.msra.gmra.mrb[16].mxu1 %v3197_v36  ;;  %v3208_v62 = vld [vmem:[%s3736_s12 + $0xd8] ss:$12 sps:$4 sm:$0xff]  }
  0xad   : > { %1648 = vmatprep.mubr.bf16.mxu1 %v3526_v59 }
  0xaf   : > { %1372 = vmatpush1.bf16.msra.mxu0 %v3120_v63  ;;  %v3210_v63 = vld [vmem:[%s3736_s12 + $0xf4] ss:$12 sps:$4 sm:$0xff]  }
  0xb0   : > { %1373 = vmatprep.subr.bf16.mxu0 %v3128_v0  ;;  %v3233_v0 = vld [vmem:[%s3736_s12 + $0x170] ss:$12 sps:$4 sm:$0xff]  }
  0xb2   : > { %688 = vmatmul.mubr.bf16.gmra.mrb[20].mxu0 %v3125_v1  ;;  %v3212_v1 = vld [vmem:[%s3736_s12 + $0xf0] ss:$12 sps:$4 sm:$0xff]  }
  0xb3   : > { %1374 = vmatpush1.bf16.msra.mxu0 %v3126_v4  ;;  %695 = vmatprep.mubr.bf16.mxu0 %v3132_v7  ;;  %v3218_v4 = vld [vmem:[%s3736_s12 + $0x124] ss:$12 sps:$4 sm:$0xff]  }
  0xb4   : > { %1375 = vmatprep.subr.bf16.mxu0 %v3131_v6  ;;  %1649 = vmatmul.mubr.bf16.gmra.mrb[20].mxu1 %v3201_v39  ;;  %v3222_v6 = vld [vmem:[%s3736_s12 + $0x13c] ss:$12 sps:$4 sm:$0xff]   ;;  %v3224_v7 = vld [vmem:[%s3736_s12 + $0x138] ss:$12 sps:$4 sm:$0xff]  }
  0xb5   : > { %1658 = vmatprep.mubr.bf16.mxu1 %v3526_v59 }
  0xb7   : > { %1376 = vmatpush1.bf16.msra.mxu0 %v3129_v10  ;;  %v3230_v10 = vld [vmem:[%s3736_s12 + $0x16c] ss:$12 sps:$4 sm:$0xff]  }
  0xb8   : > { %1377 = vmatprep.subr.bf16.mxu0 %v3137_v11  ;;  %v3232_v11 = vld [vmem:[%s3736_s12 + $0x168] ss:$12 sps:$4 sm:$0xff]  }
  0xba   : > { %696 = vmatmul.mubr.bf16.gmra.mrb[24].mxu0 %v3134_v14  ;;  %v3236_v14 = vld [vmem:[%s3736_s12 + $0x38] ss:$12 sps:$4 sm:$0xff]  }
  0xbb   : > { %1378 = vmatpush1.bf16.msra.mxu0 %v3135_v15  ;;  %703 = vmatprep.mubr.bf16.mxu0 %v3143_v17  ;;  %v3237_v17 = vld [vmem:[%s3736_s12 + $0x50] ss:$12 sps:$4 sm:$0xff]  }
  0xbc   : > { %1379 = vmatprep.subr.bf16.mxu0 %v3142_v16  ;;  %1659 = vmatmul.mubr.bf16.gmra.mrb[24].mxu1 %v3205_v42 }
  0xbd   : > { %1668 = vmatprep.mubr.bf16.mxu1 %v3526_v59 }
  0xbf   : > { %1380 = vmatpush1.bf16.msra.mxu0 %v3140_v20 }
  0xc0   : > { %1381 = vmatprep.subr.bf16.mxu0 %v3148_v21 }
  0xc2   : > { %704 = vmatmul.mubr.bf16.gmra.mrb[28].mxu0 %v3145_v22 }
  0xc3   : > { %1382 = vmatpush1.bf16.msra.mxu0 %v3146_v25  ;;  %1385 = vmatprep.mubr.bf16.mxu0 %v3154_v26 }
  0xc4   : > { %1383 = vmatprep.subr.bf16.mxu0 %v3151_v27  ;;  %1669 = vmatmul.mubr.bf16.gmra.mrb[28].mxu1 %v3209_v45 }
  0xc5   : > { %1678 = vmatprep.mubr.bf16.mxu1 %v3526_v59 }
  0xc7   : > { %1384 = vmatpush1.bf16.msra.mxu0 %v3149_v30 }
  0xc8   : > { %1546 = vmatprep.subr.bf16.mxu0 %v3775_v3  ;;  %v3216_v3 = vld [vmem:[%s3736_s12 + $0x108] ss:$12 sps:$4 sm:$0xff]  }
  0xca   : > { %1386 = vmatmul.mubr.bf16.vlgmr.msra.gmra.mrb[32].mxu0 %v3152_v33 }
  0xcb   : > { %1395 = vmatprep.mubr.bf16.mxu0 %v3155_v34  ;;  %1547 = vmatpush1.bf16.msra.mxu0 %v3773_v2  ;;  %v3214_v2 = vld [vmem:[%s3736_s12 + $0x10c] ss:$12 sps:$4 sm:$0xff]  }
  0xcc   : > { %1548 = vmatprep.subr.bf16.mxu0 %v3777_v5  ;;  %1679 = vmatmul.mubr.bf16.gmra.mrb[32].mxu1 %v3213_v48  ;;  %v3220_v5 = vld [vmem:[%s3736_s12 + $0x120] ss:$12 sps:$4 sm:$0xff]  }
  0xcd   : > { %1688 = vmatprep.mubr.bf16.mxu1 %v3526_v59  ;;  %v3239_v48 = vld [vmem:[%s3736_s12 + $0x80] ss:$12 sps:$4 sm:$0xff]  }
  0xcf   : > { %1549 = vmatpush1.bf16.msra.mxu0 %v3782_v8  ;;  %v3226_v8 = vld [vmem:[%s3736_s12 + $0x154] ss:$12 sps:$4 sm:$0xff]  }
  0xd0   : > { %1550 = vmatprep.subr.bf16.mxu0 %v3785_v9  ;;  %v3228_v9 = vld [vmem:[%s3736_s12 + $0x150] ss:$12 sps:$4 sm:$0xff]  }
  0xd2   : > { %1396 = vmatmul.mubr.bf16.gmra.mrb[36].mxu0 %v3157_v37 }
  0xd3   : > { %1405 = vmatprep.mubr.bf16.mxu0 %v3158_v38  ;;  %1551 = vmatpush1.bf16.msra.mxu0 %v3170_v12  ;;  %v3234_v12 = vld [vmem:[%s3736_s12 + $0x8] ss:$12 sps:$4 sm:$0xff]  }
  0xd4   : > { %1552 = vmatprep.subr.bf16.mxu0 %v3789_v13  ;;  %1689 = vmatmul.mubr.bf16.gmra.mrb[36].mxu1 %v3217_v51  ;;  %v3235_v13 = vld [vmem:[%s3736_s12 + $0x20] ss:$12 sps:$4 sm:$0xff]  }
  0xd5   : > { %1698 = vmatprep.mubr.bf16.mxu1 %v3526_v59 }
  0xd7   : > { %1553 = vmatpush1.bf16.msra.mxu0 %v3173_v18 }
  0xd8   : > { %1554 = vmatprep.subr.bf16.mxu0 %v3181_v19 }
  0xda   : > { %1406 = vmatmul.mubr.bf16.gmra.mrb[40].mxu0 %v3160_v40 }
  0xdb   : > { %1415 = vmatprep.mubr.bf16.mxu0 %v3167_v41  ;;  %1555 = vmatpush1.bf16.msra.mxu0 %v3179_v23 }
  0xdc   : > { %1556 = vmatprep.subr.bf16.mxu0 %v3184_v24  ;;  %1699 = vmatmul.mubr.bf16.gmra.mrb[40].mxu1 %v3221_v54 }
  0xdd   : > { %1708 = vmatprep.mubr.bf16.mxu1 %v3526_v59 }
  0xdf   : > { %1557 = vmatpush1.bf16.msra.mxu0 %v3182_v28 }
  0xe0   : > { %1558 = vmatprep.subr.bf16.mxu0 %v3190_v29 }
  0xe2   : > { %1416 = vmatmul.mubr.bf16.gmra.mrb[44].mxu0 %v3169_v43 }
  0xe3   : > { %1425 = vmatprep.mubr.bf16.mxu0 %v3176_v44  ;;  %1559 = vmatpush1.bf16.msra.mxu0 %v3188_v31 }
  0xe4   : > { %1560 = vmatprep.subr.bf16.mxu0 %v3193_v32  ;;  %1709 = vmatmul.mubr.bf16.gmra.mrb[44].mxu1 %v3225_v57  ;;  %v3238_v32 = vld [vmem:[%s3736_s12 + $0x68] ss:$12 sps:$4 sm:$0xff]   ;;  %s3398_s12 = sshll.u32 %s3527_s29, 4  ;;  %s3399_s12 = int_to_ptr.vmem [resolvable:$false] %s3398_s12 }
  0xe5   : > { %1718 = vmatprep.mubr.bf16.mxu1 %v3526_v59  ;;  %p3401_p13 = scmp.lt.s32.totalorder %s4324_s1, %s3399_s12 }
  0xe7   : > { %1561 = vmatpush1.bf16.msra.mxu0 %v3191_v35 }
  0xea   : > { %1426 = vmatmul.mubr.bf16.gmra.mrb[48].mxu0 %v3178_v46 }
  0xeb   : > { %1435 = vmatprep.mubr.bf16.mxu0 %v3185_v47 }
  0xec   : > { %1719 = vmatmul.mubr.bf16.gmra.mrb[48].mxu1 %v3229_v61 }
  0xed   : > { %1728 = vmatprep.mubr.bf16.mxu1 %v3526_v59 }
  0xf2   : > { %1436 = vmatmul.mubr.bf16.gmra.mrb[52].mxu0 %v3187_v49 }
  0xf3   : > { %1445 = vmatprep.mubr.bf16.mxu0 %v3194_v50 }
  0xf4   : > { %1729 = vmatmul.mubr.bf16.gmra.mrb[52].mxu1 %v3233_v0 }
  0xfa   : > { %1446 = vmatmul.mubr.bf16.gmra.mrb[56].mxu0 %v3196_v52 }
  0xfb   : > { %1455 = vmatprep.mubr.bf16.mxu0 %v3198_v53 }
 0x102   : > { %1456 = vmatmul.mubr.bf16.gmra.mrb[60].mxu0 %v3200_v55 }
 0x103   : > { %1465 = vmatprep.mubr.bf16.mxu0 %v3202_v56 }
 0x10a   : > { %1466 = vmatmul.mubr.bf16.gmra.mrb[64].mxu0 %v3204_v58 }
 0x10b   : > { %1475 = vmatprep.mubr.bf16.mxu0 %v3206_v60 }
 0x112   : > { %1476 = vmatmul.mubr.bf16.gmra.mrb[68].mxu0 %v3208_v62 }
 0x113   : > { %1485 = vmatprep.mubr.bf16.mxu0 %v3210_v63 }
 0x11a   : > { %1486 = vmatmul.mubr.bf16.gmra.mrb[72].mxu0 %v3212_v1 }
 0x11b   : > { %1495 = vmatprep.mubr.bf16.mxu0 %v3214_v2 }
 0x122   : > { %1496 = vmatmul.mubr.bf16.gmra.mrb[76].mxu0 %v3216_v3 }
 0x123   : > { %1505 = vmatprep.mubr.bf16.mxu0 %v3218_v4 }
 0x12a   : > { %1506 = vmatmul.mubr.bf16.gmra.mrb[80].mxu0 %v3220_v5 }
 0x12b   : > { %1515 = vmatprep.mubr.bf16.mxu0 %v3222_v6 }
 0x132   : > { %1516 = vmatmul.mubr.bf16.gmra.mrb[84].mxu0 %v3224_v7 }
 0x133   : > { %1525 = vmatprep.mubr.bf16.mxu0 %v3226_v8 }
 0x13a   : > { %1526 = vmatmul.mubr.bf16.gmra.mrb[88].mxu0 %v3228_v9 }
 0x13b   : > { %1535 = vmatprep.mubr.bf16.mxu0 %v3230_v10 }
 0x142   : > { %1536 = vmatmul.mubr.bf16.gmra.mrb[92].mxu0 %v3232_v11 }
 0x143   : > { %1578 = vmatprep.mubr.bf16.mxu0 %v3526_v59 }
 0x14a   : > { %1579 = vmatmul.mubr.bf16.vlgmr.msra.gmra.mrb[32].mxu0 %v3234_v12 }
 0x14b   : > { %1588 = vmatprep.mubr.bf16.mxu0 %v3526_v59 }
 0x152   : > { %1589 = vmatmul.mubr.bf16.gmra.mrb[36].mxu0 %v3235_v13 }
 0x153   : > { %1598 = vmatprep.mubr.bf16.mxu0 %v3526_v59 }
 0x15a   : > { %1599 = vmatmul.mubr.bf16.gmra.mrb[40].mxu0 %v3236_v14 }
 0x15b   : > { %1608 = vmatprep.mubr.bf16.mxu0 %v3526_v59 }
 0x15d   : > { %v2655_v15 = vpop.f32.mrb[0].mxu0 }
 0x15e   : > { %v2656_v16 = vpop.f32.mrb[1].mxu0 }
 0x15f   : > { %v2657_v18 = vadd.f32 %v2656_v16, %v2655_v15  ;;  %v2658_v19 = vpop.f32.mrb[2].mxu0  ;;  %v2833_v20 = vpop.f32.mrb[0].mxu1 }
 0x160   : > { %v2659_v21 = vpop.f32.mrb[3].mxu0  ;;  %v746_v22 = vpop.f32.mrb[1].mxu1 }
 0x161   : > { %v2660_v23 = vadd.f32 %v2659_v21, %v2658_v19  ;;  %v747_v24 = vadd.f32 %v2657_v18, %v746_v22  ;;  %v2834_v25 = vpop.f32.mrb[2].mxu1 }
 0x162   : > { %v749_v26 = vpop.f32.mrb[3].mxu1  ;;  %1609 = vmatmul.mubr.bf16.gmra.mrb[44].mxu0 %v3237_v17 }
 0x163   : > { %v750_v27 = vadd.f32 %v2660_v23, %v749_v26  ;;  %1618 = vmatprep.mubr.bf16.mxu0 %v3526_v59  ;;  %v1739_v28 = vmul.f32 0.125, %v747_v24 }
 0x165   : > { %v1740_v29 = vmul.f32 0.125, %v750_v27  ;;  %v2661_v30 = vpop.f32.mrb[4].mxu0 }
 0x166   : > { %v2662_v31 = vpop.f32.mrb[5].mxu0 }
 0x167   : > { %v3862_v33 = vpack.c.bf16 %v1740_v29, %v1739_v28  ;;  %v2663_v34 = vadd.f32 %v2662_v31, %v2661_v30  ;;  %v2664_v35 = vpop.f32.mrb[6].mxu0  ;;  %v2837_v36 = vpop.f32.mrb[4].mxu1 }
 0x168   : > { %v2665_v37 = vpop.f32.mrb[7].mxu0  ;;  %v762_v38 = vpop.f32.mrb[5].mxu1 }
 0x169   : > { %v755_v39 = vadd.f32 %v2833_v20, %v2663_v34  ;;  %v2666_v40 = vadd.f32 %v2665_v37, %v2664_v35  ;;  %2735 = vmatprep.mubr.bf16.mxu1 %v3862_v33  ;;  %v2838_v41 = vpop.f32.mrb[6].mxu1 }
 0x16a   : > { %1619 = vmatmul.mubr.bf16.gmra.mrb[48].mxu0 %v3238_v32  ;;  %v765_v42 = vpop.f32.mrb[7].mxu1 }
 0x16b   : > { %v758_v43 = vadd.f32 %v2834_v25, %v2666_v40  ;;  %1628 = vmatprep.mubr.bf16.mxu0 %v3526_v59  ;;  %v1741_v44 = vmul.f32 0.125, %v755_v39 }
 0x16d   : > { %v1742_v45 = vmul.f32 0.125, %v758_v43  ;;  %v2667_v46 = vpop.f32.mrb[8].mxu0 }
 0x16e   : > { %v2668_v47 = vpop.f32.mrb[9].mxu0 }
 0x16f   : > { %v2669_v49 = vadd.f32 %v2668_v47, %v2667_v46  ;;  %v2670_v50 = vpop.f32.mrb[10].mxu0  ;;  %v2841_v51 = vpop.f32.mrb[8].mxu1  ;;  %v3867_v52 = vpack.c.bf16 %v1742_v45, %v1741_v44 }
 0x170   : > { %v2671_v53 = vpop.f32.mrb[11].mxu0  ;;  %v778_v54 = vpop.f32.mrb[9].mxu1 }
 0x171   : > { %v2672_v55 = vadd.f32 %v2671_v53, %v2670_v50  ;;  %v763_v56 = vadd.f32 %v2669_v49, %v762_v38  ;;  %v2842_v57 = vpop.f32.mrb[10].mxu1 }
 0x172   : > { %1629 = vmatmul.mubr.bf16.gmra.mrb[52].mxu0 %v3239_v48  ;;  %v781_v58 = vpop.f32.mrb[11].mxu1 }
 0x173   : > { %v766_v60 = vadd.f32 %v2672_v55, %v765_v42  ;;  %v1743_v61 = vmul.f32 0.125, %v763_v56 }
 0x175   : > { %v1744_v59 = vmul.f32 0.125, %v766_v60  ;;  %v2673_v62 = vpop.f32.mrb[12].mxu0 }
 0x176   : > { %v2674_v63 = vpop.f32.mrb[13].mxu0 }
 0x177   : > { %v3869_v0 = vpack.c.bf16 %v1744_v59, %v1743_v61  ;;  %v2675_v1 = vadd.f32 %v2674_v63, %v2673_v62  ;;  %v2676_v2 = vpop.f32.mrb[14].mxu0  ;;  %v2845_v4 = vpop.f32.mrb[12].mxu1 }
 0x178   : > { %v2677_v3 = vpop.f32.mrb[15].mxu0  ;;  %v794_v7 = vpop.f32.mrb[13].mxu1 }
 0x179   : > { %v771_v5 = vadd.f32 %v2837_v36, %v2675_v1  ;;  %v2678_v6 = vadd.f32 %v2677_v3, %v2676_v2  ;;  %v2846_v8 = vpop.f32.mrb[14].mxu1 }
 0x17a   : > { %v797_v10 = vpop.f32.mrb[15].mxu1 }
 0x17b   : > { %v774_v9 = vadd.f32 %v2838_v41, %v2678_v6  ;;  %v1745_v11 = vmul.f32 0.125, %v771_v5 }
 0x17d   : > { %v1746_v12 = vmul.f32 0.125, %v774_v9  ;;  %v2679_v13 = vpop.f32.mrb[16].mxu0 }
 0x17e   : > { %v2680_v14 = vpop.f32.mrb[17].mxu0 }
 0x17f   : > { %v2681_v15 = vadd.f32 %v2680_v14, %v2679_v13  ;;  %v2682_v16 = vpop.f32.mrb[18].mxu0  ;;  %v3871_v17 = vpack.c.bf16 %v1746_v12, %v1745_v11  ;;  %v1640_v61 = vpop.f32.mrb[16].mxu1 }
 0x180   : > { %v2683_v18 = vpop.f32.mrb[19].mxu0  ;;  %v1642_v59 = vpop.f32.mrb[17].mxu1 }
 0x181   : > { %v2684_v19 = vadd.f32 %v2683_v18, %v2682_v16  ;;  %v779_v20 = vadd.f32 %v2681_v15, %v778_v54  ;;  %v1644_v62 = vpop.f32.mrb[18].mxu1 }
 0x182   : > { %v1646_v63 = vpop.f32.mrb[19].mxu1 }
 0x183   : > { %v782_v21 = vadd.f32 %v2684_v19, %v781_v58  ;;  %v1747_v22 = vmul.f32 0.125, %v779_v20 }
 0x185   : > { %v1748_v23 = vmul.f32 0.125, %v782_v21  ;;  %v2685_v24 = vpop.f32.mrb[20].mxu0 }
 0x186   : > { %v2686_v25 = vpop.f32.mrb[21].mxu0 }
 0x187   : > { %v3873_v26 = vpack.c.bf16 %v1748_v23, %v1747_v22  ;;  %v2687_v27 = vadd.f32 %v2686_v25, %v2685_v24  ;;  %v2688_v28 = vpop.f32.mrb[22].mxu0  ;;  %v1650_v1 = vpop.f32.mrb[20].mxu1 }
 0x188   : > { %v2689_v29 = vpop.f32.mrb[23].mxu0  ;;  %v1652_v2 = vpop.f32.mrb[21].mxu1 }
 0x189   : > { %v787_v30 = vadd.f32 %v2841_v51, %v2687_v27  ;;  %v2690_v31 = vadd.f32 %v2689_v29, %v2688_v28  ;;  %v1654_v3 = vpop.f32.mrb[22].mxu1 }
 0x18a   : > { %v1656_v5 = vpop.f32.mrb[23].mxu1 }
 0x18b   : > { %v790_v32 = vadd.f32 %v2842_v57, %v2690_v31  ;;  %v1749_v34 = vmul.f32 0.125, %v787_v30 }
 0x18d   : > { %v1750_v35 = vmul.f32 0.125, %v790_v32  ;;  %v2691_v36 = vpop.f32.mrb[24].mxu0 }
 0x18e   : > { %v2692_v37 = vpop.f32.mrb[25].mxu0 }
 0x18f   : > { %v2693_v38 = vadd.f32 %v2692_v37, %v2691_v36  ;;  %v2694_v39 = vpop.f32.mrb[26].mxu0  ;;  %v3875_v40 = vpack.c.bf16 %v1750_v35, %v1749_v34  ;;  %v1660_v6 = vpop.f32.mrb[24].mxu1 }
 0x190   : > { %v2695_v41 = vpop.f32.mrb[27].mxu0 }
 0x191   : > { %v2696_v42 = vadd.f32 %v2695_v41, %v2694_v39  ;;  %v795_v43 = vadd.f32 %v2693_v38, %v794_v7  ;;  %v1662_v7 = vpop.f32.mrb[25].mxu1 }
 0x192   : > { %v1664_v9 = vpop.f32.mrb[26].mxu1 }
 0x193   : > { %v798_v44 = vadd.f32 %v2696_v42, %v797_v10  ;;  %v1751_v45 = vmul.f32 0.125, %v795_v43  ;;  %v1666_v10 = vpop.f32.mrb[27].mxu1 }
 0x195   : > { %v1752_v46 = vmul.f32 0.125, %v798_v44  ;;  %v2697_v47 = vpop.f32.mrb[28].mxu0 }
 0x196   : > { %v2698_v48 = vpop.f32.mrb[29].mxu0 }
 0x197   : > { %v3877_v49 = vpack.c.bf16 %v1752_v46, %v1751_v45  ;;  %v2699_v50 = vadd.f32 %v2698_v48, %v2697_v47  ;;  %v2700_v51 = vpop.f32.mrb[30].mxu0  ;;  %v1670_v11 = vpop.f32.mrb[28].mxu1 }
 0x198   : > { %v2701_v53 = vpop.f32.mrb[31].mxu0 }
 0x199   : > { %v803_v54 = vadd.f32 %v2845_v4, %v2699_v50  ;;  %v2702_v55 = vadd.f32 %v2701_v53, %v2700_v51  ;;  %v1672_v4 = vpop.f32.mrb[29].mxu1 }
 0x19a   : > { %v1674_v12 = vpop.f32.mrb[30].mxu1 }
 0x19b   : > { %v806_v56 = vadd.f32 %v2846_v8, %v2702_v55  ;;  %v1753_v57 = vmul.f32 0.125, %v803_v54  ;;  %v1676_v8 = vpop.f32.mrb[31].mxu1 }
 0x19d   : > { %v1754_v58 = vmul.f32 0.125, %v806_v56 }
 0x19f   : > { %v3879_v60 = vpack.c.bf16 %v1754_v58, %v1753_v57  ;;  %v3881_v13 = vpop.f32.mrb[32].mxu1 }
 0x1a0   : > { %v3883_v14 = vpop.f32.mrb[33].mxu1 }
 0x1a1   : > { %v3885_v15 = vpop.f32.mrb[34].mxu1 }
 0x1a2   : > { %v3887_v16 = vpop.f32.mrb[35].mxu1 }
 0x1a7   : > { %v3889_v18 = vpop.f32.mrb[36].mxu1 }
 0x1a8   : > { %v3891_v19 = vpop.f32.mrb[37].mxu1 }
 0x1a9   : > { %v3893_v20 = vpop.f32.mrb[38].mxu1 }
 0x1aa   : > { %v3895_v22 = vpop.f32.mrb[39].mxu1 }
 0x1af   : > { %v3907_v32 = vpop.f32.mrb[40].mxu1 }
 0x1b0   : > { %v3911_v35 = vpop.f32.mrb[41].mxu1 }
 0x1b1   : > { %v3913_v36 = vpop.f32.mrb[42].mxu1 }
 0x1b2   : > { %v3915_v38 = vpop.f32.mrb[43].mxu1 }
 0x1b7   : > { %v3927_v48 = vpop.f32.mrb[44].mxu1 }
 0x1b8   : > { %v3931_v51 = vpop.f32.mrb[45].mxu1 }
 0x1b9   : > { %v3933_v53 = vpop.f32.mrb[46].mxu1 }
 0x1ba   : > { %v3935_v55 = vpop.f32.mrb[47].mxu1 }
 0x1cd   : > { %v1447_v21 = vpop.f32.mrb[56].mxu0 }
 0x1ce   : > { %v3897_v23 = vadd.f32 %v1640_v61, %v1447_v21  ;;  %v1449_v24 = vpop.f32.mrb[57].mxu0 }
 0x1cf   : > { %v3899_v25 = vadd.f32 %v1642_v59, %v1449_v24  ;;  %v1451_v27 = vpop.f32.mrb[58].mxu0 }
 0x1d0   : > { %v3901_v28 = vadd.f32 %v1644_v62, %v1451_v27  ;;  %v1453_v29 = vpop.f32.mrb[59].mxu0 }
 0x1d1   : > { %v3903_v30 = vadd.f32 %v1646_v63, %v1453_v29 }
 0x1d2   : > { %v1769_v31 = vpack.c.bf16 %v3901_v28, %v3897_v23 }
 0x1d5   : > { %v1457_v37 = vpop.f32.mrb[60].mxu0 }
 0x1d6   : > { %v3917_v39 = vadd.f32 %v1650_v1, %v1457_v37  ;;  %v1459_v41 = vpop.f32.mrb[61].mxu0 }
 0x1d7   : > { %v3919_v42 = vadd.f32 %v1652_v2, %v1459_v41  ;;  %v1461_v43 = vpop.f32.mrb[62].mxu0  ;;  %v1720_v2 = vpop.f32.mrb[48].mxu1 }
 0x1d8   : > { %v3921_v44 = vadd.f32 %v1654_v3, %v1461_v43  ;;  %v1463_v45 = vpop.f32.mrb[63].mxu0 }
 0x1d9   : > { %v3923_v46 = vadd.f32 %v1656_v5, %v1463_v45  ;;  %v1722_v5 = vpop.f32.mrb[49].mxu1 }
 0x1da   : > { %v1770_v47 = vpack.c.bf16 %v3921_v44, %v3917_v39  ;;  %v1724_v21 = vpop.f32.mrb[50].mxu1 }
 0x1db   : > { %v1726_v27 = vpop.f32.mrb[51].mxu1  ;;  %v4432_v39 = vpack.c.bf16 %v3923_v46, %v3919_v42 }
 0x1dc   : > { %v1730_v45 = vpop.f32.mrb[52].mxu1 }
 0x1dd   : > { %v1467_v54 = vpop.f32.mrb[64].mxu0 }
 0x1de   : > { %v1661_v56 = vadd.f32 %v1660_v6, %v1467_v54  ;;  %v1469_v57 = vpop.f32.mrb[65].mxu0 }
 0x1df   : > { %v3937_v58 = vadd.f32 %v1662_v7, %v1469_v57  ;;  %v1471_v61 = vpop.f32.mrb[66].mxu0 }
 0x1e0   : > { %v1665_v59 = vadd.f32 %v1664_v9, %v1471_v61  ;;  %v1473_v62 = vpop.f32.mrb[67].mxu0 }
 0x1e1   : > { %v3939_v63 = vadd.f32 %v1666_v10, %v1473_v62 }
 0x1e2   : > { %v1771_v1 = vpack.c.bf16 %v1665_v59, %v1661_v56  ;;  %v1732_v56 = vpop.f32.mrb[53].mxu1 }
 0x1e3   : > { %v1734_v57 = vpop.f32.mrb[54].mxu1 }
 0x1e4   : > { %2719 = vmatprep.subr.bf16.mxu1 %v1771_v1  ;;  %v1736_v61 = vpop.f32.mrb[55].mxu1 }
 0x1e5   : > { %v1477_v24 = vpop.f32.mrb[68].mxu0 }
 0x1e6   : > { %v3943_v29 = vadd.f32 %v1670_v11, %v1477_v24  ;;  %v1479_v6 = vpop.f32.mrb[69].mxu0 }
 0x1e7   : > { %v3945_v7 = vadd.f32 %v1672_v4, %v1479_v6  ;;  %v1481_v37 = vpop.f32.mrb[70].mxu0 }
 0x1e8   : > { %v3947_v9 = vadd.f32 %v1674_v12, %v1481_v37  ;;  %v1483_v10 = vpop.f32.mrb[71].mxu0 }
 0x1e9   : > { %v3949_v41 = vadd.f32 %v1676_v8, %v1483_v10 }
 0x1ea   : > { %v1772_v43 = vpack.c.bf16 %v3947_v9, %v3943_v29 }
 0x1ed   : > { %v1487_v11 = vpop.f32.mrb[72].mxu0 }
 0x1ee   : > { %v3956_v4 = vadd.f32 %v3881_v13, %v1487_v11  ;;  %v1489_v59 = vpop.f32.mrb[73].mxu0 }
 0x1ef   : > { %v3959_v12 = vadd.f32 %v3883_v14, %v1489_v59  ;;  %v1491_v8 = vpop.f32.mrb[74].mxu0 }
 0x1f0   : > { %v3962_v62 = vadd.f32 %v3885_v15, %v1491_v8  ;;  %v1493_v1 = vpop.f32.mrb[75].mxu0 }
 0x1f1   : > { %v3965_v24 = vadd.f32 %v3887_v16, %v1493_v1 }
 0x1f2   : > { %v1773_v6 = vpack.c.bf16 %v3962_v62, %v3956_v4 }
 0x1f3   : > { %v4426_v23 = vpack.c.bf16 %v3965_v24, %v3959_v12 }
 0x1f5   : > { %v1497_v13 = vpop.f32.mrb[76].mxu0 }
 0x1f6   : > { %v3972_v10 = vadd.f32 %v3889_v18, %v1497_v13  ;;  %v1499_v14 = vpop.f32.mrb[77].mxu0 }
 0x1f7   : > { %v3975_v11 = vadd.f32 %v3891_v19, %v1499_v14  ;;  %v1501_v15 = vpop.f32.mrb[78].mxu0 }
 0x1f8   : > { %v3978_v59 = vadd.f32 %v3893_v20, %v1501_v15  ;;  %v1503_v16 = vpop.f32.mrb[79].mxu0 }
 0x1f9   : > { %v3981_v8 = vadd.f32 %v3895_v22, %v1503_v16 }
 0x1fa   : > { %v1774_v1 = vpack.c.bf16 %v3978_v59, %v3972_v10 }
 0x1fd   : > { %v1507_v18 = vpop.f32.mrb[80].mxu0 }
 0x1fe   : > { %v3988_v13 = vadd.f32 %v3907_v32, %v1507_v18  ;;  %v1509_v19 = vpop.f32.mrb[81].mxu0 }
 0x1ff   : > { %v3991_v14 = vadd.f32 %v3911_v35, %v1509_v19  ;;  %v1511_v20 = vpop.f32.mrb[82].mxu0 }
 0x200   : > { %v3994_v15 = vadd.f32 %v3913_v36, %v1511_v20  ;;  %v1513_v22 = vpop.f32.mrb[83].mxu0 }
 0x201   : > { %v3997_v16 = vadd.f32 %v3915_v38, %v1513_v22 }
 0x202   : > { %v1775_v34 = vpack.c.bf16 %v3994_v15, %v3988_v13 }
 0x203   : > { %v4428_v28 = vpack.c.bf16 %v3997_v16, %v3991_v14 }
 0x205   : > { %v1517_v32 = vpop.f32.mrb[84].mxu0 }
 0x206   : > { %v4004_v18 = vadd.f32 %v3927_v48, %v1517_v32  ;;  %v1519_v35 = vpop.f32.mrb[85].mxu0 }
 0x207   : > { %v4007_v19 = vadd.f32 %v3931_v51, %v1519_v35  ;;  %v1521_v36 = vpop.f32.mrb[86].mxu0 }
 0x208   : > { %v4010_v20 = vadd.f32 %v3933_v53, %v1521_v36  ;;  %v1523_v38 = vpop.f32.mrb[87].mxu0 }
 0x209   : > { %v4013_v22 = vadd.f32 %v3935_v55, %v1523_v38 }
 0x20a   : > { %v1776_v13 = vpack.c.bf16 %v4010_v20, %v4004_v18 }
 0x20d   : > { %v1527_v48 = vpop.f32.mrb[88].mxu0 }
 0x20e   : > { %v4019_v32 = vadd.f32 %v1720_v2, %v1527_v48  ;;  %v1529_v50 = vpop.f32.mrb[89].mxu0 }
 0x20f   : > { %v4021_v51 = vadd.f32 %v1722_v5, %v1529_v50  ;;  %v1531_v35 = vpop.f32.mrb[90].mxu0 }
 0x210   : > { %v1725_v37 = vadd.f32 %v1724_v21, %v1531_v35  ;;  %v1533_v53 = vpop.f32.mrb[91].mxu0 }
 0x211   : > { %v4023_v36 = vadd.f32 %v1726_v27, %v1533_v53 }
 0x212   : > { %v1777_v55 = vpack.c.bf16 %v1725_v37, %v4019_v32 }
 0x215   : > { %v1537_v18 = vpop.f32.mrb[92].mxu0 }
 0x216   : > { %v1731_v20 = vadd.f32 %v1730_v45, %v1537_v18  ;;  %v1539_v54 = vpop.f32.mrb[93].mxu0 }
 0x217   : > { %v4028_v15 = vadd.f32 %v1732_v56, %v1539_v54  ;;  %v1541_v2 = vpop.f32.mrb[94].mxu0 }
 0x218   : > { %v1735_v48 = vadd.f32 %v1734_v57, %v1541_v2  ;;  %v1543_v3 = vpop.f32.mrb[95].mxu0 }
 0x219   : > { %v4030_v50 = vadd.f32 %v1736_v61, %v1543_v3 }
 0x21a   : > { %v1778_v5 = vpack.c.bf16 %v1735_v48, %v1731_v20 }
 0x21b   : > { %v1794_v21 = vpack.c.bf16 %v4030_v50, %v4028_v15 }
 0x21d   : > { %v1580_v27 = vpop.f32.mrb[32].mxu0 }
 0x21e   : > { %v1582_v35 = vpop.f32.mrb[33].mxu0 }
 0x21f   : > { %v1584_v37 = vpop.f32.mrb[34].mxu0 }
 0x220   : > { %v1763_v32 = vpack.c.bf16 %v1584_v37, %v1580_v27  ;;  %v1586_v53 = vpop.f32.mrb[35].mxu0 }
 0x221   : > { %v1779_v38 = vpack.c.bf16 %v1586_v53, %v1582_v35 }
 0x222   : > { %2720 = vmatpush3.bf16.xpose.msra.mxu1 %v1763_v32 }
 0x223   : > { %2721 = vmatprep.subr.bf16.mxu1 %v1772_v43 }
 0x225   : > { %v1590_v45 = vpop.f32.mrb[36].mxu0 }
 0x226   : > { %v1592_v54 = vpop.f32.mrb[37].mxu0 }
 0x227   : > { %v1594_v56 = vpop.f32.mrb[38].mxu0 }
 0x228   : > { %v1764_v3 = vpack.c.bf16 %v1594_v56, %v1590_v45  ;;  %v1596_v57 = vpop.f32.mrb[39].mxu0 }
 0x229   : > { %v1780_v61 = vpack.c.bf16 %v1596_v57, %v1592_v54 }
 0x22a   : > { %2722 = vmatpush3.bf16.xpose.msra.mxu1 %v1764_v3 }
 0x22b   : > { %2723 = vmatprep.subr.bf16.mxu1 %v1773_v6 }
 0x22d   : > { %v1600_v18 = vpop.f32.mrb[40].mxu0 }
 0x22e   : > { %v1602_v20 = vpop.f32.mrb[41].mxu0 }
 0x22f   : > { %v1604_v2 = vpop.f32.mrb[42].mxu0 }
 0x230   : > { %v1765_v48 = vpack.c.bf16 %v1604_v2, %v1600_v18  ;;  %v1606_v27 = vpop.f32.mrb[43].mxu0 }
 0x231   : > { %v1781_v35 = vpack.c.bf16 %v1606_v27, %v1602_v20 }
 0x232   : > { %2724 = vmatpush3.bf16.xpose.msra.mxu1 %v1765_v48 }
 0x233   : > { %2725 = vmatprep.subr.bf16.mxu1 %v1774_v1 }
 0x235   : > { %v1610_v29 = vpop.f32.mrb[44].mxu0 }
 0x236   : > { %v1612_v9 = vpop.f32.mrb[45].mxu0 }
 0x237   : > { %v1614_v43 = vpop.f32.mrb[46].mxu0 }
 0x238   : > { %v1766_v37 = vpack.c.bf16 %v1614_v43, %v1610_v29  ;;  %v1616_v32 = vpop.f32.mrb[47].mxu0 }
 0x239   : > { %v1782_v53 = vpack.c.bf16 %v1616_v32, %v1612_v9 }
 0x23a   : > { %2726 = vmatpush3.bf16.xpose.msra.mxu1 %v1766_v37 }
 0x23b   : > { %2727 = vmatprep.subr.bf16.mxu1 %v1775_v34  ;;  %v4424_v34 = vpack.c.bf16 %v3939_v63, %v3937_v58 }
 0x23d   : > { %v1620_v4 = vpop.f32.mrb[48].mxu0 }
 0x23e   : > { %v1622_v62 = vpop.f32.mrb[49].mxu0 }
 0x23f   : > { %v1624_v6 = vpop.f32.mrb[50].mxu0 }
 0x240   : > { %v1767_v45 = vpack.c.bf16 %v1624_v6, %v1620_v4  ;;  %v1626_v54 = vpop.f32.mrb[51].mxu0 }
 0x241   : > { %v1783_v56 = vpack.c.bf16 %v1626_v54, %v1622_v62 }
 0x242   : > { %2728 = vmatpush3.bf16.xpose.msra.mxu1 %v1767_v45 }
 0x243   : > { %2729 = vmatprep.subr.bf16.mxu1 %v1776_v13  ;;  %v4425_v13 = vpack.c.bf16 %v3949_v41, %v3945_v7 }
 0x245   : > { %v1630_v3 = vpop.f32.mrb[52].mxu0 }
 0x246   : > { %v1632_v57 = vpop.f32.mrb[53].mxu0 }
 0x247   : > { %v1634_v10 = vpop.f32.mrb[54].mxu0 }
 0x248   : > { %v1768_v59 = vpack.c.bf16 %v1634_v10, %v1630_v3  ;;  %v1636_v1 = vpop.f32.mrb[55].mxu0 }
 0x249   : > { %v1784_v18 = vpack.c.bf16 %v1636_v1, %v1632_v57 }
 0x24a   : > { %2730 = vmatpush3.bf16.xpose.msra.mxu1 %v1768_v59 }
 0x24b   : > { %2731 = vmatprep.subr.bf16.mxu1 %v1777_v55 }
 0x252   : > { %2732 = vmatpush3.bf16.xpose.msra.mxu1 %v1769_v31  ;;  %v4430_v31 = vpack.c.bf16 %v4023_v36, %v4021_v51 }
 0x253   : > { %2733 = vmatprep.subr.bf16.mxu1 %v1778_v5 }
 0x25a   : > { %2734 = vmatpush3.bf16.xpose.msra.mxu1 %v1770_v47 }
 0x25b   : > { %2751 = vmatprep.subr.bf16.mxu1 %v4424_v34 }
 0x261   : > { %2736 = vmatmul.mubr.bf16.vlgmr.msra.gmra.mrb[56].mxu1 %v3862_v33  ;;  %v4427_v33 = vpack.c.bf16 %v3981_v8, %v3975_v11 }
 0x262   : > { %2737 = vmatprep.mubr.bf16.mxu1 %v3867_v52  ;;  %2752 = vmatpush3.bf16.msra.mxu1 %v1779_v38 }
 0x263   : > { %2753 = vmatprep.subr.bf16.mxu1 %v4425_v13 }
 0x266   : > { %2754 = vmatpush3.bf16.msra.mxu1 %v1780_v61 }
 0x267   : > { %2755 = vmatprep.subr.bf16.mxu1 %v4426_v23 }
 0x269   : > { %2738 = vmatmul.mubr.bf16.gmra.mrb[60].mxu1 %v3867_v52  ;;  %v4429_v52 = vpack.c.bf16 %v4013_v22, %v4007_v19 }
 0x26a   : > { %2739 = vmatprep.mubr.bf16.mxu1 %v3869_v0  ;;  %2756 = vmatpush3.bf16.msra.mxu1 %v1781_v35 }
 0x26b   : > { %2757 = vmatprep.subr.bf16.mxu1 %v4427_v33 }
 0x26e   : > { %2758 = vmatpush3.bf16.msra.mxu1 %v1782_v53 }
 0x26f   : > { %2759 = vmatprep.subr.bf16.mxu1 %v4428_v28 }
 0x271   : > { %2740 = vmatmul.mubr.bf16.gmra.mrb[64].mxu1 %v3869_v0  ;;  %v4431_v0 = vpack.c.bf16 %v3903_v30, %v3899_v25  ;;  %v4098_v30 = vstv %s2486_s17  ;;  %s3400_s17 = scalar_lea.vmem %s3399_s12, 4096 }
 0x272   : > { %2741 = vmatprep.mubr.bf16.mxu1 %v3871_v17  ;;  %2760 = vmatpush3.bf16.msra.mxu1 %v1783_v56  ;;  %p3402_p0 = scmp.lt.s32.totalorder %s3400_s17, %s3394_s30 }
 0x273   : > { %2761 = vmatprep.subr.bf16.mxu1 %v4429_v52 }
 0x274   : > { %p3403_p2 = por %p3402_p0, %p3401_p13 }
 0x276   : > { %2762 = vmatpush3.bf16.msra.mxu1 %v1784_v18  ;;  %p3404_p5 = pnand %p3403_p2, %p3397_p11 }
 0x277   : > { %2763 = vmatprep.subr.bf16.mxu1 %v4430_v31 }
 0x279   : > { %2742 = vmatmul.mubr.bf16.gmra.mrb[68].mxu1 %v3871_v17  ;;  %v1908_v17 = vlaneseq }
 0x27a   : > { %2743 = vmatprep.mubr.bf16.mxu1 %v3873_v26  ;;  %2764 = vmatpush3.bf16.msra.mxu1 %v4431_v0 }
 0x27b   : > { %2765 = vmatprep.subr.bf16.mxu1 %v1794_v21  ;;  %v4094_v25 = vshrl.u32 %v1908_v17, 7  ;;  %v4100_v42 = vand.u32 127, %v1908_v17 }
 0x27d   : > { %v4106_v44 = vadd.s32 128, %v4100_v42  ;;  %v1912_v63 = vadd.s32 24, %v4094_v25  ;;  %v1913_v19 = vadd.s32 32, %v4094_v25  ;;  %v1914_v51 = vadd.s32 40, %v4094_v25 }
 0x27e   : > { %2766 = vmatpush3.bf16.msra.mxu1 %v4432_v39  ;;  %v1915_v27 = vadd.s32 48, %v4094_v25  ;;  %v1916_v9 = vadd.s32 56, %v4094_v25  ;;  %v1917_v57 = vadd.s32 64, %v4094_v25  ;;  %v1918_v59 = vadd.s32 72, %v4094_v25 }
 0x27f   : > { %v1929_v16 = vadd.s32 %v4098_v30, %v1912_v63  ;;  %v1930_v5 = vadd.s32 %v4098_v30, %v1913_v19  ;;  %v1931_v48 = vadd.s32 %v4098_v30, %v1914_v51  ;;  %v1919_v17 = vadd.s32 80, %v4094_v25 }
 0x280   : > { %v1932_v4 = vadd.s32 %v4098_v30, %v1915_v27  ;;  %v1933_v56 = vadd.s32 %v4098_v30, %v1916_v9  ;;  %v1934_v23 = vadd.s32 %v4098_v30, %v1917_v57  ;;  %v1935_v0 = vadd.s32 %v4098_v30, %v1918_v59 }
 0x281   : > { %2744 = vmatmul.mubr.bf16.gmra.mrb[72].mxu1 %v3873_v26  ;;  %v1910_v26 = vadd.s32 8, %v4094_v25  ;;  %vm1951_vm6 = vcmp.le.s32.totalorder %v4100_v42, %v1929_v16  ;;  %vm1952_vm7 = vcmp.le.s32.totalorder %v4106_v44, %v1929_v16  ;;  %vm1953_vm8 = vcmp.le.s32.totalorder %v4100_v42, %v1930_v5 }
 0x282   : > { %2745 = vmatprep.mubr.bf16.mxu1 %v3875_v40  ;;  %vm1954_vm9 = vcmp.le.s32.totalorder %v4106_v44, %v1930_v5  ;;  %vm1955_vm10 = vcmp.le.s32.totalorder %v4100_v42, %v1931_v48  ;;  %vm1956_vm11 = vcmp.le.s32.totalorder %v4106_v44, %v1931_v48  ;;  %vm1957_vm12 = vcmp.le.s32.totalorder %v4100_v42, %v1932_v4 }
 0x283   : > { %vm1958_vm13 = vcmp.le.s32.totalorder %v4106_v44, %v1932_v4  ;;  %vm1959_vm14 = vcmp.le.s32.totalorder %v4100_v42, %v1933_v56  ;;  %vm1960_vm15 = vcmp.le.s32.totalorder %v4106_v44, %v1933_v56  ;;  %v1936_v63 = vadd.s32 %v4098_v30, %v1919_v17 }
 0x284   : > { %v1922_v51 = vadd.s32 104, %v4094_v25 }
 0x286   : > { %v1939_v9 = vadd.s32 %v4098_v30, %v1922_v51 }
 0x289   : > { %2746 = vmatmul.mubr.bf16.gmra.mrb[76].mxu1 %v3875_v40  ;;  %v1926_v40 = vadd.s32 %v4098_v30, %v4094_v25 }
 0x28a   : > { %2747 = vmatprep.mubr.bf16.mxu1 %v3877_v49 }
 0x28b   : > { %vm1945_vm0 = vcmp.le.s32.totalorder %v4100_v42, %v1926_v40  ;;  %vm1946_vm1 = vcmp.le.s32.totalorder %v4106_v44, %v1926_v40  ;;  %v1920_v40 = vadd.s32 88, %v4094_v25 }
 0x28d   : > { %v1937_v16 = vadd.s32 %v4098_v30, %v1920_v40 }
 0x291   : > { %2748 = vmatmul.mubr.bf16.gmra.mrb[80].mxu1 %v3877_v49  ;;  %v1927_v49 = vadd.s32 %v4098_v30, %v1910_v26 }
 0x292   : > { %2749 = vmatprep.mubr.bf16.mxu1 %v3879_v60 }
 0x293   : > { %vm1947_vm2 = vcmp.le.s32.totalorder %v4100_v42, %v1927_v49  ;;  %vm1948_vm3 = vcmp.le.s32.totalorder %v4106_v44, %v1927_v49 }
 0x299   : > { %2750 = vmatmul.mubr.bf16.gmra.mrb[84].mxu1 %v3879_v60  ;;  %v1911_v60 = vadd.s32 16, %v4094_v25 }
 0x29b   : > { %v1928_v12 = vadd.s32 %v4098_v30, %v1911_v60 }
 0x29d   : > { %vm1949_vm4 = vcmp.le.s32.totalorder %v4100_v42, %v1928_v12  ;;  %vm1950_vm5 = vcmp.le.s32.totalorder %v4106_v44, %v1928_v12 }
 0x334   : > { %v1829_v46 = vpop.f32.mrb[56].mxu1 }
 0x335   : > { %v4112_v47 = vsel %vm1945_vm0, %v1829_v46, -inf  ;;  %v1831_v58 = vpop.f32.mrb[57].mxu1  ;;  %vm1961_vm0 = vcmp.le.s32.totalorder %v4100_v42, %v1934_v23 }
 0x336   : > { %v4117_v7 = vsel %vm1946_vm1, %v1831_v58, -inf  ;;  %v1833_v41 = vpop.f32.mrb[58].mxu1  ;;  %vm1962_vm1 = vcmp.le.s32.totalorder %v4106_v44, %v1934_v23 }
 0x337   : > { %v1835_v24 = vpop.f32.mrb[59].mxu1  ;;  %v2009_v11 = vmax.f32 %v4112_v47, %v4117_v7  ;;  %v4122_v8 = vsel %vm1947_vm2, %v1833_v41, -inf  ;;  %vm1963_vm2 = vcmp.le.s32.totalorder %v4100_v42, %v1935_v0 }
 0x338   : > { %v4124_v14 = vsel %vm1948_vm3, %v1835_v24, -inf  ;;  %vm1964_vm3 = vcmp.le.s32.totalorder %v4106_v44, %v1935_v0 }
 0x339   : > { %2010 = vmax.xlane.f32.xlu0 %v2009_v11  ;;  %v2012_v22 = vmax.f32 %v4122_v8, %v4124_v14 }
 0x33c   : > { %v1839_v15 = vpop.f32.mrb[60].mxu1 }
 0x33d   : > { %v4133_v36 = vsel %vm1949_vm4, %v1839_v15, -inf  ;;  %2013 = vmax.xlane.f32.xlu0 %v2012_v22  ;;  %v1841_v55 = vpop.f32.mrb[61].mxu1  ;;  %vm1965_vm4 = vcmp.le.s32.totalorder %v4100_v42, %v1936_v63  ;;  %v1921_v22 = vadd.s32 96, %v4094_v25 }
 0x33e   : > { %v4137_v38 = vsel %vm1950_vm5, %v1841_v55, -inf  ;;  %v1843_v50 = vpop.f32.mrb[62].mxu1  ;;  %vm1966_vm5 = vcmp.le.s32.totalorder %v4106_v44, %v1936_v63 }
 0x33f   : > { %v1845_v21 = vpop.f32.mrb[63].mxu1  ;;  %v2015_v61 = vmax.f32 %v4133_v36, %v4137_v38  ;;  %v4142_v20 = vsel %vm1951_vm6, %v1843_v50, -inf  ;;  %vm1967_vm6 = vcmp.le.s32.totalorder %v4100_v42, %v1937_v16 }
 0x340   : > { %v4144_v2 = vsel %vm1952_vm7, %v1845_v21, -inf  ;;  %vm1968_vm7 = vcmp.le.s32.totalorder %v4106_v44, %v1937_v16 }
 0x341   : > { %2016 = vmax.xlane.f32.xlu1 %v2015_v61  ;;  %v2018_v35 = vmax.f32 %v4142_v20, %v4144_v2  ;;  %v1938_v61 = vadd.s32 %v4098_v30, %v1921_v22 }
 0x344   : > { %v1849_v29 = vpop.f32.mrb[64].mxu1 }
 0x345   : > { %v4154_v43 = vsel %vm1953_vm8, %v1849_v29, -inf  ;;  %2019 = vmax.xlane.f32.xlu1 %v2018_v35  ;;  %v1851_v37 = vpop.f32.mrb[65].mxu1  ;;  %vm1969_vm8 = vcmp.le.s32.totalorder %v4100_v42, %v1938_v61 }
 0x346   : > { %v4157_v32 = vsel %vm1954_vm9, %v1851_v37, -inf  ;;  %v1853_v53 = vpop.f32.mrb[66].mxu1  ;;  %vm1970_vm9 = vcmp.le.s32.totalorder %v4106_v44, %v1938_v61 }
 0x347   : > { %v4160_v62 = vsel %vm1955_vm10, %v1853_v53, -inf  ;;  %v1855_v6 = vpop.f32.mrb[67].mxu1  ;;  %v2021_v45 = vmax.f32 %v4154_v43, %v4157_v32  ;;  %v1923_v53 = vadd.s32 112, %v4094_v25  ;;  %vm1971_vm10 = vcmp.le.s32.totalorder %v4100_v42, %v1939_v9 }
 0x348   : > { %v4164_v54 = vsel %vm1956_vm11, %v1855_v6, -inf  ;;  %v1924_v6 = vadd.s32 120, %v4094_v25  ;;  %vm1972_vm11 = vcmp.le.s32.totalorder %v4106_v44, %v1939_v9 }
 0x349   : > { %2022 = vmax.xlane.f32.xlu0 %v2021_v45  ;;  %v2024_v3 = vmax.f32 %v4160_v62, %v4164_v54 }
 0x34a   : > { %v1941_v25 = vadd.s32 %v4098_v30, %v1924_v6 }
 0x34b   : > { %2025 = vmax.xlane.f32.xlu1 %v2024_v3 }
 0x34c   : > { %v1859_v10 = vpop.f32.mrb[68].mxu1 }
 0x34d   : > { %v4174_v1 = vsel %vm1957_vm12, %v1859_v10, -inf  ;;  %v1861_v18 = vpop.f32.mrb[69].mxu1  ;;  %v1940_v10 = vadd.s32 %v4098_v30, %v1923_v53 }
 0x34e   : > { %v4177_v34 = vsel %vm1958_vm13, %v1861_v18, -inf  ;;  %v1863_v13 = vpop.f32.mrb[70].mxu1 }
 0x34f   : > { %v4180_v33 = vsel %vm1959_vm14, %v1863_v13, -inf  ;;  %v1865_v28 = vpop.f32.mrb[71].mxu1  ;;  %v2027_v52 = vmax.f32 %v4174_v1, %v4177_v34  ;;  %vm1973_vm12 = vcmp.le.s32.totalorder %v4100_v42, %v1940_v10  ;;  %vm1974_vm13 = vcmp.le.s32.totalorder %v4106_v44, %v1940_v10 }
 0x350   : > { %v4184_v31 = vsel %vm1960_vm15, %v1865_v28, -inf  ;;  %vm1975_vm14 = vcmp.le.s32.totalorder %v4100_v42, %v1941_v25  ;;  %vm1976_vm15 = vcmp.le.s32.totalorder %v4106_v44, %v1941_v25 }
 0x351   : > { %2028 = vmax.xlane.f32.xlu0 %v2027_v52  ;;  %v2030_v39 = vmax.f32 %v4180_v33, %v4184_v31 }
 0x353   : > { %2031 = vmax.xlane.f32.xlu1 %v2030_v39 }
 0x354   : > { %v1869_v26 = vpop.f32.mrb[72].mxu1 }
 0x355   : > { %v4194_v49 = vsel %vm1961_vm0, %v1869_v26, -inf  ;;  %v1871_v60 = vpop.f32.mrb[73].mxu1 }
 0x356   : > { %v4197_v46 = vsel %vm1962_vm1, %v1871_v60, -inf  ;;  %v1873_v58 = vpop.f32.mrb[74].mxu1 }
 0x357   : > { %v4200_v41 = vsel %vm1963_vm2, %v1873_v58, -inf  ;;  %v1875_v12 = vpop.f32.mrb[75].mxu1  ;;  %v2033_v24 = vmax.f32 %v4194_v49, %v4197_v46 }
 0x358   : > { %v4204_v11 = vsel %vm1964_vm3, %v1875_v12, -inf }
 0x359   : > { %2034 = vmax.xlane.f32.xlu0 %v2033_v24  ;;  %v2036_v19 = vmax.f32 %v4200_v41, %v4204_v11 }
 0x35b   : > { %2037 = vmax.xlane.f32.xlu1 %v2036_v19 }
 0x35c   : > { %v1879_v15 = vpop.f32.mrb[76].mxu1 }
 0x35d   : > { %v4214_v55 = vsel %vm1965_vm4, %v1879_v15, -inf  ;;  %v1881_v50 = vpop.f32.mrb[77].mxu1 }
 0x35e   : > { %v4217_v5 = vsel %vm1966_vm5, %v1881_v50, -inf  ;;  %v1883_v21 = vpop.f32.mrb[78].mxu1 }
 0x35f   : > { %v4220_v48 = vsel %vm1967_vm6, %v1883_v21, -inf  ;;  %v1885_v27 = vpop.f32.mrb[79].mxu1  ;;  %v2039_v35 = vmax.f32 %v4214_v55, %v4217_v5 }
 0x360   : > { %v4224_v29 = vsel %vm1968_vm7, %v1885_v27, -inf }
 0x361   : > { %2040 = vmax.xlane.f32.xlu0 %v2039_v35  ;;  %v2042_v37 = vmax.f32 %v4220_v48, %v4224_v29 }
 0x363   : > { %2043 = vmax.xlane.f32.xlu1 %v2042_v37 }
 0x364   : > { %v1889_v4 = vpop.f32.mrb[80].mxu1 }
 0x365   : > { %v4234_v45 = vsel %vm1969_vm8, %v1889_v4, -inf  ;;  %v1891_v56 = vpop.f32.mrb[81].mxu1 }
 0x366   : > { %v4237_v3 = vsel %vm1970_vm9, %v1891_v56, -inf  ;;  %v1893_v57 = vpop.f32.mrb[82].mxu1 }
 0x367   : > { %v4240_v59 = vsel %vm1971_vm10, %v1893_v57, -inf  ;;  %v1895_v18 = vpop.f32.mrb[83].mxu1  ;;  %v2045_v13 = vmax.f32 %v4234_v45, %v4237_v3 }
 0x368   : > { %v4244_v23 = vsel %vm1972_vm11, %v1895_v18, -inf }
 0x369   : > { %2046 = vmax.xlane.f32.xlu0 %v2045_v13  ;;  %v2048_v28 = vmax.f32 %v4240_v59, %v4244_v23 }
 0x36b   : > { %2049 = vmax.xlane.f32.xlu1 %v2048_v28 }
 0x36c   : > { %v1899_v52 = vpop.f32.mrb[84].mxu1 }
 0x36d   : > { %v4252_v0 = vsel %vm1973_vm12, %v1899_v52, -inf  ;;  %v1901_v39 = vpop.f32.mrb[85].mxu1 }
 0x36e   : > { %v4255_v17 = vsel %vm1974_vm13, %v1901_v39, -inf  ;;  %v1903_v30 = vpop.f32.mrb[86].mxu1 }
 0x36f   : > { %v4257_v26 = vsel %vm1975_vm14, %v1903_v30, -inf  ;;  %v1905_v40 = vpop.f32.mrb[87].mxu1  ;;  %v2051_v60 = vmax.f32 %v4252_v0, %v4255_v17 }
 0x370   : > { %v4261_v58 = vsel %vm1976_vm15, %v1905_v40, -inf }
 0x371   : > { %2052 = vmax.xlane.f32.xlu0 %v2051_v60  ;;  %v2054_v42 = vmax.f32 %v4257_v26, %v4261_v58 }
 0x373   : > { %2055 = vmax.xlane.f32.xlu1 %v2054_v42 }
 0x3c6   : > { %v2011_v63 = vpop.xlane.xlu0 %2010 }
 0x3c7   : > { %v2057_v12 = vsub.f32 %v4112_v47, %v2011_v63  ;;  %v2058_v44 = vsub.f32 %v4117_v7, %v2011_v63 }
 0x3c9   : > { %v2089_v24 = vmul.f32 1.442695, %v2057_v12  ;;  %v2091_v16 = vmul.f32 1.442695, %v2058_v44 }
 0x3ca   : > { %v2014_v19 = vpop.xlane.xlu0 %2013 }
 0x3cb   : > { %3240 = vpow2.f32 %v2089_v24  ;;  %v2059_v22 = vsub.f32 %v4122_v8, %v2014_v19  ;;  %v2060_v15 = vsub.f32 %v4124_v14, %v2014_v19 }
 0x3cc   : > { %3242 = vpow2.f32 %v2091_v16 }
 0x3cd   : > { %v2093_v51 = vmul.f32 1.442695, %v2059_v22  ;;  %v2095_v50 = vmul.f32 1.442695, %v2060_v15 }
 0x3ce   : > { %v2017_v21 = vpop.xlane.xlu1 %2016 }
 0x3cf   : > { %3244 = vpow2.f32 %v2093_v51  ;;  %v2061_v61 = vsub.f32 %v4133_v36, %v2017_v21  ;;  %v2062_v27 = vsub.f32 %v4137_v38, %v2017_v21 }
 0x3d0   : > { %3246 = vpow2.f32 %v2095_v50 }
 0x3d1   : > { %v2097_v47 = vmul.f32 1.442695, %v2061_v61  ;;  %v2099_v7 = vmul.f32 1.442695, %v2062_v27 }
 0x3d2   : > { %v2020_v35 = vpop.xlane.xlu1 %2019 }
 0x3d3   : > { %3248 = vpow2.f32 %v2097_v47  ;;  %v2063_v9 = vsub.f32 %v4142_v20, %v2020_v35  ;;  %v2064_v8 = vsub.f32 %v4144_v2, %v2020_v35 }
 0x3d4   : > { %3250 = vpow2.f32 %v2099_v7 }
 0x3d5   : > { %v3241_v14 = vpop.eup %3240  ;;  %v2101_v37 = vmul.f32 1.442695, %v2063_v9  ;;  %v2103_v53 = vmul.f32 1.442695, %v2064_v8 }
 0x3d6   : > { %v3243_v4 = vpop.eup %3242  ;;  %v2023_v6 = vpop.xlane.xlu0 %2022 }
 0x3d7   : > { %3252 = vpow2.f32 %v2101_v37  ;;  %v2065_v36 = vsub.f32 %v4154_v43, %v2023_v6  ;;  %v2066_v38 = vsub.f32 %v4157_v32, %v2023_v6  ;;  %v2153_v56 = vadd.f32 %v3243_v4, %v3241_v14 }
 0x3d8   : > { %3254 = vpow2.f32 %v2103_v53  ;;  %v2026_v57 = vpop.xlane.xlu1 %2025 }
 0x3d9   : > { %v3245_v10 = vpop.eup %3244  ;;  %v2105_v18 = vmul.f32 1.442695, %v2065_v36  ;;  %v2107_v13 = vmul.f32 1.442695, %v2066_v38  ;;  %v2067_v20 = vsub.f32 %v4160_v62, %v2026_v57  ;;  %v2068_v2 = vsub.f32 %v4164_v54, %v2026_v57  ;;  %2154 = vadd.xlane.f32.xlu0 %v2153_v56 }
 0x3da   : > { %v3247_v25 = vpop.eup %3246  ;;  %v2201_v28 = vpack.c.bf16 %v3245_v10, %v3241_v14 }
 0x3db   : > { %3256 = vpow2.f32 %v2105_v18  ;;  %v2109_v52 = vmul.f32 1.442695, %v2067_v20  ;;  %v2111_v39 = vmul.f32 1.442695, %v2068_v2  ;;  %v2202_v30 = vpack.c.bf16 %v3247_v25, %v3243_v4 }
 0x3dc   : > { %3258 = vpow2.f32 %v2107_v13  ;;  %v2156_v43 = vadd.f32 %v3247_v25, %v3245_v10 }
 0x3dd   : > { %v3249_v32 = vpop.eup %3248  ;;  %3260 = vpow2.f32 %v2109_v52  ;;  %2249 = vmatprep.mubr.bf16.mxu1 %v2202_v30 }
 0x3de   : > { %v3251_v40 = vpop.eup %3250  ;;  %3262 = vpow2.f32 %v2111_v39  ;;  %2157 = vadd.xlane.f32.xlu1 %v2156_v43  ;;  %2250 = vmatmul.mubr.bf16.vlgmr.msra.gmra.mrb[88].mxu1 %v2201_v28  ;;  %v2029_v60 = vpop.xlane.xlu0 %2028 }
 0x3df   : > { %v2069_v62 = vsub.f32 %v4174_v1, %v2029_v60  ;;  %v2070_v54 = vsub.f32 %v4177_v34, %v2029_v60  ;;  %v2159_v42 = vadd.f32 %v3251_v40, %v3249_v32 }
 0x3e0   : > { %v2032_v63 = vpop.xlane.xlu1 %2031 }
 0x3e1   : > { %v3253_v12 = vpop.eup %3252  ;;  %v2113_v44 = vmul.f32 1.442695, %v2069_v62  ;;  %v2115_v24 = vmul.f32 1.442695, %v2070_v54  ;;  %v2071_v16 = vsub.f32 %v4180_v33, %v2032_v63  ;;  %v2072_v19 = vsub.f32 %v4184_v31, %v2032_v63  ;;  %2160 = vadd.xlane.f32.xlu0 %v2159_v42 }
 0x3e2   : > { %v3255_v22 = vpop.eup %3254  ;;  %v2203_v15 = vpack.c.bf16 %v3253_v12, %v3249_v32 }
 0x3e3   : > { %3264 = vpow2.f32 %v2113_v44  ;;  %v2117_v51 = vmul.f32 1.442695, %v2071_v16  ;;  %v2119_v50 = vmul.f32 1.442695, %v2072_v19  ;;  %v2162_v21 = vadd.f32 %v3255_v22, %v3253_v12 }
 0x3e4   : > { %3266 = vpow2.f32 %v2115_v24  ;;  %v2204_v1 = vpack.c.bf16 %v3255_v22, %v3251_v40 }
 0x3e5   : > { %v3257_v61 = vpop.eup %3256  ;;  %3268 = vpow2.f32 %v2117_v51  ;;  %2163 = vadd.xlane.f32.xlu1 %v2162_v21 }
 0x3e6   : > { %v3259_v34 = vpop.eup %3258  ;;  %3270 = vpow2.f32 %v2119_v50  ;;  %2257 = vmatprep.mubr.bf16.mxu1 %v2204_v1  ;;  %v2035_v27 = vpop.xlane.xlu0 %2034 }
 0x3e7   : > { %v3261_v47 = vpop.eup %3260  ;;  %2258 = vmatmul.mubr.bf16.gmra.mrb[92].mxu1 %v2203_v15  ;;  %v2073_v33 = vsub.f32 %v4194_v49, %v2035_v27  ;;  %v2074_v31 = vsub.f32 %v4197_v46, %v2035_v27  ;;  %v2165_v7 = vadd.f32 %v3259_v34, %v3257_v61 }
 0x3e8   : > { %v3263_v35 = vpop.eup %3262  ;;  %v2038_v9 = vpop.xlane.xlu1 %2037  ;;  %v2205_v46 = vpack.c.bf16 %v3261_v47, %v3257_v61 }
 0x3e9   : > { %v2121_v8 = vmul.f32 1.442695, %v2073_v33  ;;  %v2123_v14 = vmul.f32 1.442695, %v2074_v31  ;;  %v2075_v37 = vsub.f32 %v4200_v41, %v2038_v9  ;;  %v2076_v53 = vsub.f32 %v4204_v11, %v2038_v9  ;;  %2166 = vadd.xlane.f32.xlu0 %v2165_v7 }
 0x3ea   : > { %v2168_v4 = vadd.f32 %v3263_v35, %v3261_v47  ;;  %v2206_v6 = vpack.c.bf16 %v3263_v35, %v3259_v34 }
 0x3eb   : > { %3272 = vpow2.f32 %v2121_v8  ;;  %v2125_v36 = vmul.f32 1.442695, %v2075_v37  ;;  %v2127_v38 = vmul.f32 1.442695, %v2076_v53 }
 0x3ec   : > { %3274 = vpow2.f32 %v2123_v14  ;;  %2169 = vadd.xlane.f32.xlu1 %v2168_v4  ;;  %2265 = vmatprep.mubr.bf16.mxu1 %v2206_v6 }
 0x3ed   : > { %v3265_v49 = vpop.eup %3264  ;;  %3276 = vpow2.f32 %v2125_v36 }
 0x3ee   : > { %v3267_v56 = vpop.eup %3266  ;;  %3278 = vpow2.f32 %v2127_v38  ;;  %v2041_v57 = vpop.xlane.xlu0 %2040 }
 0x3ef   : > { %v3269_v10 = vpop.eup %3268  ;;  %2266 = vmatmul.mubr.bf16.gmra.mrb[96].mxu1 %v2205_v46  ;;  %v2077_v41 = vsub.f32 %v4214_v55, %v2041_v57  ;;  %v2078_v11 = vsub.f32 %v4217_v5, %v2041_v57  ;;  %v2171_v18 = vadd.f32 %v3267_v56, %v3265_v49 }
 0x3f0   : > { %v3271_v13 = vpop.eup %3270  ;;  %v2044_v20 = vpop.xlane.xlu1 %2043  ;;  %v2207_v5 = vpack.c.bf16 %v3269_v10, %v3265_v49 }
 0x3f1   : > { %v2129_v2 = vmul.f32 1.442695, %v2077_v41  ;;  %v2131_v25 = vmul.f32 1.442695, %v2078_v11  ;;  %v2079_v28 = vsub.f32 %v4220_v48, %v2044_v20  ;;  %v2080_v52 = vsub.f32 %v4224_v29, %v2044_v20  ;;  %2172 = vadd.xlane.f32.xlu0 %v2171_v18 }
 0x3f2   : > { %v2174_v39 = vadd.f32 %v3271_v13, %v3269_v10  ;;  %v2208_v30 = vpack.c.bf16 %v3271_v13, %v3267_v56 }
 0x3f3   : > { %3280 = vpow2.f32 %v2129_v2  ;;  %v2133_v43 = vmul.f32 1.442695, %v2079_v28  ;;  %v2135_v32 = vmul.f32 1.442695, %v2080_v52 }
 0x3f4   : > { %3282 = vpow2.f32 %v2131_v25  ;;  %2175 = vadd.xlane.f32.xlu1 %v2174_v39  ;;  %2273 = vmatprep.mubr.bf16.mxu1 %v2208_v30 }
 0x3f5   : > { %v3273_v55 = vpop.eup %3272  ;;  %3284 = vpow2.f32 %v2133_v43 }
 0x3f6   : > { %v3275_v40 = vpop.eup %3274  ;;  %3286 = vpow2.f32 %v2135_v32  ;;  %v2047_v60 = vpop.xlane.xlu0 %2046 }
 0x3f7   : > { %v3277_v62 = vpop.eup %3276  ;;  %2274 = vmatmul.mubr.bf16.gmra.mrb[100].mxu1 %v2207_v5  ;;  %v2081_v48 = vsub.f32 %v4234_v45, %v2047_v60  ;;  %v2082_v29 = vsub.f32 %v4237_v3, %v2047_v60  ;;  %v2177_v54 = vadd.f32 %v3275_v40, %v3273_v55 }
 0x3f8   : > { %v3279_v42 = vpop.eup %3278  ;;  %v2050_v63 = vpop.xlane.xlu1 %2049  ;;  %v2209_v3 = vpack.c.bf16 %v3277_v62, %v3273_v55 }
 0x3f9   : > { %v2137_v12 = vmul.f32 1.442695, %v2081_v48  ;;  %v2139_v44 = vmul.f32 1.442695, %v2082_v29  ;;  %v2083_v24 = vsub.f32 %v4240_v59, %v2050_v63  ;;  %v2084_v16 = vsub.f32 %v4244_v23, %v2050_v63  ;;  %2178 = vadd.xlane.f32.xlu0 %v2177_v54 }
 0x3fa   : > { %v2180_v19 = vadd.f32 %v3279_v42, %v3277_v62  ;;  %v2210_v22 = vpack.c.bf16 %v3279_v42, %v3275_v40 }
 0x3fb   : > { %3288 = vpow2.f32 %v2137_v12  ;;  %v2141_v15 = vmul.f32 1.442695, %v2083_v24  ;;  %v2143_v51 = vmul.f32 1.442695, %v2084_v16 }
 0x3fc   : > { %3290 = vpow2.f32 %v2139_v44  ;;  %2181 = vadd.xlane.f32.xlu1 %v2180_v19  ;;  %2281 = vmatprep.mubr.bf16.mxu1 %v2210_v22 }
 0x3fd   : > { %v3281_v45 = vpop.eup %3280  ;;  %3292 = vpow2.f32 %v2141_v15 }
 0x3fe   : > { %v3283_v50 = vpop.eup %3282  ;;  %3294 = vpow2.f32 %v2143_v51  ;;  %v2053_v21 = vpop.xlane.xlu0 %2052 }
 0x3ff   : > { %v3285_v1 = vpop.eup %3284  ;;  %2282 = vmatmul.mubr.bf16.gmra.mrb[104].mxu1 %v2209_v3  ;;  %v2085_v59 = vsub.f32 %v4252_v0, %v2053_v21  ;;  %v2086_v23 = vsub.f32 %v4255_v17, %v2053_v21  ;;  %v2183_v61 = vadd.f32 %v3283_v50, %v3281_v45 }
 0x400   : > { %v3287_v34 = vpop.eup %3286  ;;  %v2056_v27 = vpop.xlane.xlu1 %2055  ;;  %v2211_v17 = vpack.c.bf16 %v3285_v1, %v3281_v45 }
 0x401   : > { %v2145_v47 = vmul.f32 1.442695, %v2085_v59  ;;  %v2147_v33 = vmul.f32 1.442695, %v2086_v23  ;;  %2184 = vadd.xlane.f32.xlu0 %v2183_v61  ;;  %v2087_v31 = vsub.f32 %v4257_v26, %v2056_v27  ;;  %v2088_v7 = vsub.f32 %v4261_v58, %v2056_v27 }
 0x402   : > { %v2186_v35 = vadd.f32 %v3287_v34, %v3285_v1  ;;  %v2212_v9 = vpack.c.bf16 %v3287_v34, %v3283_v50 }
 0x403   : > { %3296 = vpow2.f32 %v2145_v47  ;;  %v2149_v8 = vmul.f32 1.442695, %v2087_v31  ;;  %v2151_v14 = vmul.f32 1.442695, %v2088_v7 }
 0x404   : > { %3298 = vpow2.f32 %v2147_v33  ;;  %2187 = vadd.xlane.f32.xlu1 %v2186_v35  ;;  %2289 = vmatprep.mubr.bf16.mxu1 %v2212_v9 }
 0x405   : > { %v3289_v0 = vpop.eup %3288  ;;  %3300 = vpow2.f32 %v2149_v8 }
 0x406   : > { %v3291_v37 = vpop.eup %3290  ;;  %3302 = vpow2.f32 %v2151_v14 }
 0x407   : > { %v3293_v53 = vpop.eup %3292  ;;  %2290 = vmatmul.mubr.bf16.gmra.mrb[108].mxu1 %v2211_v17  ;;  %v2189_v4 = vadd.f32 %v3291_v37, %v3289_v0 }
 0x408   : > { %v3295_v6 = vpop.eup %3294  ;;  %v2213_v38 = vpack.c.bf16 %v3293_v53, %v3289_v0 }
 0x409   : > { %2190 = vadd.xlane.f32.xlu0 %v2189_v4  ;;  %v2192_v26 = vadd.f32 %v3295_v6, %v3293_v53  ;;  %v2214_v58 = vpack.c.bf16 %v3295_v6, %v3291_v37 }
 0x40b   : > { %2193 = vadd.xlane.f32.xlu1 %v2192_v26  ;;  %2297 = vmatprep.mubr.bf16.mxu1 %v2214_v58 }
 0x40d   : > { %v3297_v36 = vpop.eup %3296 }
 0x40e   : > { %v3299_v49 = vpop.eup %3298 }
 0x40f   : > { %v3301_v46 = vpop.eup %3300  ;;  %2298 = vmatmul.mubr.bf16.gmra.mrb[112].mxu1 %v2213_v38  ;;  %v2195_v56 = vadd.f32 %v3299_v49, %v3297_v36 }
 0x410   : > { %v3303_v57 = vpop.eup %3302  ;;  %v2215_v11 = vpack.c.bf16 %v3301_v46, %v3297_v36 }
 0x411   : > { %2196 = vadd.xlane.f32.xlu0 %v2195_v56  ;;  %v2198_v10 = vadd.f32 %v3303_v57, %v3301_v46  ;;  %v2216_v41 = vpack.c.bf16 %v3303_v57, %v3299_v49 }
 0x413   : > { %2199 = vadd.xlane.f32.xlu1 %v2198_v10  ;;  %2305 = vmatprep.mubr.bf16.mxu1 %v2216_v41 }
 0x417   : > { %2306 = vmatmul.mubr.bf16.gmra.mrb[116].mxu1 %v2215_v11 }
 0x466   : > { %v2155_v18 = vpop.xlane.xlu0 %2154 }
 0x467   : > { %3304 = vrcp.f32 %v2155_v18 }
 0x46b   : > { %v2158_v13 = vpop.xlane.xlu1 %2157 }
 0x46c   : > { %3306 = vrcp.f32 %v2158_v13 }
 0x46e   : > { %v2161_v20 = vpop.xlane.xlu0 %2160 }
 0x46f   : > { %3308 = vrcp.f32 %v2161_v20 }
 0x471   : > { %v3305_v30 = vpop.eup %3304 }
 0x472   : > { %v2164_v25 = vpop.xlane.xlu1 %2163 }
 0x473   : > { %3310 = vrcp.f32 %v2164_v25 }
 0x476   : > { %v3307_v5 = vpop.eup %3306  ;;  %v2167_v60 = vpop.xlane.xlu0 %2166 }
 0x477   : > { %3312 = vrcp.f32 %v2167_v60 }
 0x479   : > { %v2170_v62 = vpop.xlane.xlu1 %2169  ;;  %v3309_v63 = vpop.eup %3308 }
 0x47a   : > { %3314 = vrcp.f32 %v2170_v62 }
 0x47d   : > { %v3311_v16 = vpop.eup %3310 }
 0x47e   : > { %v2173_v19 = vpop.xlane.xlu0 %2172 }
 0x47f   : > { %3316 = vrcp.f32 %v2173_v19 }
 0x481   : > { %v2176_v15 = vpop.xlane.xlu1 %2175  ;;  %v3313_v21 = vpop.eup %3312 }
 0x482   : > { %3318 = vrcp.f32 %v2176_v15 }
 0x484   : > { %v3315_v61 = vpop.eup %3314 }
 0x486   : > { %v2179_v34 = vpop.xlane.xlu0 %2178 }
 0x487   : > { %3320 = vrcp.f32 %v2179_v34 }
 0x489   : > { %v2182_v47 = vpop.xlane.xlu1 %2181  ;;  %v3317_v9 = vpop.eup %3316 }
 0x48a   : > { %3322 = vrcp.f32 %v2182_v47 }
 0x48c   : > { %v3319_v17 = vpop.eup %3318 }
 0x48e   : > { %v2185_v37 = vpop.xlane.xlu0 %2184 }
 0x48f   : > { %3324 = vrcp.f32 %v2185_v37 }
 0x491   : > { %v2188_v4 = vpop.xlane.xlu1 %2187  ;;  %v3321_v38 = vpop.eup %3320 }
 0x492   : > { %3326 = vrcp.f32 %v2188_v4 }
 0x494   : > { %v3323_v57 = vpop.eup %3322 }
 0x496   : > { %v2191_v10 = vpop.xlane.xlu0 %2190 }
 0x497   : > { %3328 = vrcp.f32 %v2191_v10 }
 0x498   : > { %v2194_v11 = vpop.xlane.xlu1 %2193 }
 0x499   : > { %v3325_v25 = vpop.eup %3324  ;;  %3330 = vrcp.f32 %v2194_v11 }
 0x4b1   : > { %v2767_v2 = vpop.f32.mrb[88].mxu1 }
 0x4b2   : > { %v2768_v28 = vpop.f32.mrb[89].mxu1 }
 0x4b3   : > { %v2769_v52 = vadd.f32 %v2768_v28, %v2767_v2  ;;  %v2770_v39 = vpop.f32.mrb[90].mxu1 }
 0x4b4   : > { %v2771_v43 = vpop.f32.mrb[91].mxu1 }
 0x4b5   : > { %v2330_v32 = vmul.f32 %v3305_v30, %v2769_v52  ;;  %v2772_v55 = vadd.f32 %v2771_v43, %v2770_v39  ;;  %v3327_v30 = vpop.eup %3326  ;;  %v2197_v43 = vpop.xlane.xlu0 %2196 }
 0x4b6   : > { %3332 = vrcp.f32 %v2197_v43 }
 0x4b7   : > { %2346 = vst [vmem:[%s4300_s23] sm:$0xff] %v2330_v32  ;;  %v2331_v40 = vmul.f32 %v3307_v5, %v2772_v55  ;;  %v2200_v55 = vpop.xlane.xlu1 %2199 }
 0x4b8   : > { %3334 = vrcp.f32 %v2200_v55 }
 0x4b9   : > { %2347 = vst [vmem:[%s4300_s23 + $0x8] sm:$0xff] %v2331_v40 }
 0x4ba   : > { %v2773_v48 = vpop.f32.mrb[92].mxu1 }
 0x4bb   : > { %v2774_v29 = vpop.f32.mrb[93].mxu1 }
 0x4bc   : > { %v2775_v54 = vadd.f32 %v2774_v29, %v2773_v48  ;;  %v2776_v42 = vpop.f32.mrb[94].mxu1  ;;  %v3329_v48 = vpop.eup %3328 }
 0x4bd   : > { %v2777_v12 = vpop.f32.mrb[95].mxu1 }
 0x4be   : > { %v2332_v44 = vmul.f32 %v3309_v63, %v2775_v54  ;;  %v2778_v24 = vadd.f32 %v2777_v12, %v2776_v42  ;;  %v3331_v63 = vpop.eup %3330 }
 0x4c0   : > { %2348 = vst [vmem:[%s4300_s23 + $0x10] sm:$0xff] %v2332_v44  ;;  %v2333_v22 = vmul.f32 %v3311_v16, %v2778_v24 }
 0x4c2   : > { %2349 = vst [vmem:[%s4300_s23 + $0x18] sm:$0xff] %v2333_v22  ;;  %v2779_v51 = vpop.f32.mrb[96].mxu1  ;;  %v3333_v22 = vpop.eup %3332 }
 0x4c3   : > { %v2780_v45 = vpop.f32.mrb[97].mxu1 }
 0x4c4   : > { %v2781_v3 = vadd.f32 %v2780_v45, %v2779_v51  ;;  %v2782_v50 = vpop.f32.mrb[98].mxu1 }
 0x4c5   : > { %v2783_v1 = vpop.f32.mrb[99].mxu1 }
 0x4c6   : > { %v2334_v59 = vmul.f32 %v3313_v21, %v2781_v3  ;;  %v2784_v23 = vadd.f32 %v2783_v1, %v2782_v50  ;;  %v3335_v3 = vpop.eup %3334 }
 0x4c8   : > { %2350 = vst [vmem:[%s4300_s23 + $0x20] sm:$0xff] %v2334_v59  ;;  %v2335_v27 = vmul.f32 %v3315_v61, %v2784_v23 }
 0x4ca   : > { %2351 = vst [vmem:[%s4300_s23 + $0x28] sm:$0xff] %v2335_v27  ;;  %v2785_v33 = vpop.f32.mrb[100].mxu1 }
 0x4cb   : > { %v2786_v31 = vpop.f32.mrb[101].mxu1 }
 0x4cc   : > { %v2787_v7 = vadd.f32 %v2786_v31, %v2785_v33  ;;  %v2788_v35 = vpop.f32.mrb[102].mxu1 }
 0x4cd   : > { %v2789_v8 = vpop.f32.mrb[103].mxu1 }
 0x4ce   : > { %v2336_v14 = vmul.f32 %v3317_v9, %v2787_v7  ;;  %v2790_v0 = vadd.f32 %v2789_v8, %v2788_v35 }
 0x4d0   : > { %2352 = vst [vmem:[%s4300_s23 + $0x30] sm:$0xff] %v2336_v14  ;;  %v2337_v53 = vmul.f32 %v3319_v17, %v2790_v0 }
 0x4d2   : > { %2353 = vst [vmem:[%s4300_s23 + $0x38] sm:$0xff] %v2337_v53  ;;  %v2791_v6 = vpop.f32.mrb[104].mxu1 }
 0x4d3   : > { %v2792_v26 = vpop.f32.mrb[105].mxu1 }
 0x4d4   : > { %v2793_v58 = vadd.f32 %v2792_v26, %v2791_v6  ;;  %v2794_v36 = vpop.f32.mrb[106].mxu1 }
 0x4d5   : > { %v2795_v49 = vpop.f32.mrb[107].mxu1 }
 0x4d6   : > { %v2338_v46 = vmul.f32 %v3321_v38, %v2793_v58  ;;  %v2796_v56 = vadd.f32 %v2795_v49, %v2794_v36 }
 0x4d8   : > { %2354 = vst [vmem:[%s4300_s23 + $0x40] sm:$0xff] %v2338_v46  ;;  %v2339_v41 = vmul.f32 %v3323_v57, %v2796_v56 }
 0x4da   : > { %2355 = vst [vmem:[%s4300_s23 + $0x48] sm:$0xff] %v2339_v41  ;;  %v2797_v18 = vpop.f32.mrb[108].mxu1 }
 0x4db   : > { %v2798_v13 = vpop.f32.mrb[109].mxu1 }
 0x4dc   : > { %v2799_v20 = vadd.f32 %v2798_v13, %v2797_v18  ;;  %v2800_v2 = vpop.f32.mrb[110].mxu1 }
 0x4dd   : > { %v2801_v28 = vpop.f32.mrb[111].mxu1 }
 0x4de   : > { %v2340_v52 = vmul.f32 %v3325_v25, %v2799_v20  ;;  %v2802_v39 = vadd.f32 %v2801_v28, %v2800_v2 }
 0x4e0   : > { %2356 = vst [vmem:[%s4300_s23 + $0x50] sm:$0xff] %v2340_v52  ;;  %v2341_v32 = vmul.f32 %v3327_v30, %v2802_v39 }
 0x4e2   : > { %2357 = vst [vmem:[%s4300_s23 + $0x58] sm:$0xff] %v2341_v32  ;;  %v2803_v5 = vpop.f32.mrb[112].mxu1 }
 0x4e3   : > { %v2804_v40 = vpop.f32.mrb[113].mxu1 }
 0x4e4   : > { %v2805_v60 = vadd.f32 %v2804_v40, %v2803_v5  ;;  %v2806_v62 = vpop.f32.mrb[114].mxu1 }
 0x4e5   : > { %v2807_v29 = vpop.f32.mrb[115].mxu1 }
 0x4e6   : > { %v2342_v54 = vmul.f32 %v3329_v48, %v2805_v60  ;;  %v2808_v42 = vadd.f32 %v2807_v29, %v2806_v62 }
 0x4e8   : > { %2358 = vst [vmem:[%s4300_s23 + $0x60] sm:$0xff] %v2342_v54  ;;  %v2343_v12 = vmul.f32 %v3331_v63, %v2808_v42 }
 0x4ea   : > { %2359 = vst [vmem:[%s4300_s23 + $0x68] sm:$0xff] %v2343_v12  ;;  %v2809_v44 = vpop.f32.mrb[116].mxu1 }
 0x4eb   : > { %v2810_v24 = vpop.f32.mrb[117].mxu1 }
 0x4ec   : > { %v2811_v16 = vadd.f32 %v2810_v24, %v2809_v44  ;;  %v2812_v19 = vpop.f32.mrb[118].mxu1 }
 0x4ed   : > { %v2813_v15 = vpop.f32.mrb[119].mxu1 }
 0x4ee   : > { %v2344_v51 = vmul.f32 %v3333_v22, %v2811_v16  ;;  %v2814_v45 = vadd.f32 %v2813_v15, %v2812_v19 }
 0x4f0   : > { %2360 = vst [vmem:[%s4300_s23 + $0x70] sm:$0xff] %v2344_v51  ;;  %v2345_v50 = vmul.f32 %v3335_v3, %v2814_v45 }
 0x4f2   : > { %2361 = vst [vmem:[%s4300_s23 + $0x78] sm:$0xff] %v2345_v50 }
 0x4f3   : > { %3407 = shalt.err (!%p3404_p5)
}
 0x4f4   : > { %s3408_s22 = scalar_lea.hbm %s4322_s26, 2048  ;;  %s3412_s6 = scalar_lea.hbm %s4393_s2, 8192 }
 0x4f5   : > { %p3409_p8 = scmp.ne.s32.totalorder %s4322_s26, %s3408_s22  ;;  %p3413_p6 = scmp.lt.u32.totalorder %s4322_s26, %s4393_s2 }
 0x4f6   : > { %p3414_p10 = scmp.lt.u32.totalorder %s3412_s6, %s3408_s22  ;;  %p3416_p4 = scmp.lt.u32.totalorder %s3408_s22, %s4322_s26 }
 0x4f7   : > { %p3410_p12 = pnand %p3409_p8, %p4433_p7 }
 0x4f8   : > { %p3415_p3 = por %p3414_p10, %p3413_p6 }
 0x4f9   : > { %p3411_p1 = pneg %p3410_p12 }
 0x4fa   : > { %p3417_p9 = por %p3416_p4, %p3415_p3 }
 0x4fc   : > { %p3418_p11 = pnand %p3417_p9, %p3411_p1 }
 0x4fe   : > { %3421 = shalt.err (!%p3418_p11)
}
 0x4ff   : > { %s3528_s8 = smov 128   ;;  %s3529_s20 = smov 8  }
 0x500   : > { %2936 = dma.vmem_to_hbm [thread:$0]  (%p4433_p7), %s4324_s1, 2048, %s4322_s26, %s4330_s5, %s3528_s8, %s3528_s8, %s3529_s20  }
 0x501 PF: > { %s4434_s3 = sld [smem:[#allocation12_spill]]  ;;  %p2953_p13 = scmp.ge.s32.totalorder %s3520_s19, 2 }
 0x502   : > { %s2393_s4 = sand.u32 1, %s3480_s9  }
 0x503   : > { %s2394_s15 = scalar_lea.sflag [#allocation4], %s2393_s4 }
 0x507   : > { %p4435_p0 = scmp.ne.s32.totalorder %s4434_s3, 0 }
 0x509   : > { %p2947_p2 = pnand %p2953_p13, %p4435_p0 }
 0x50b   : > { %3475 = dma.done.wait (!%p2947_p2), %s2394_s15, 2048  }
 0x50c   : > { %3477 = vsyncadd (!%p2947_p2), %s2394_s15, 4294965248  ;;  %s19_s19 = sadd.s32 1, %s3520_s19   ;;  %s4436_s15 = sld [smem:[#allocation11_spill]] }
 0x50d   : > { %p16_p5 = scmp.ge.s32.totalorder %s19_s19, 6   ;;  %s4437_s17 = sld [smem:[#allocation13_spill]] }
 0x50e   : > { %s4438_s25 = sld [smem:[#allocation14_spill]]  ;;  %s4439_s9 = smov %s3484_s10 }
 0x50f   : > { %s4440_s10 = smov %s3488_s11  ;;  %s4441_s11 = smov %s3685_s28 }
 0x510   : > { %s4442_s12 = smov %s3496_s13  ;;  %s4443_s13 = smov %s3500_s14 }
 0x511   : > { %s4444_s14 = smov %s3680_s21  ;;  %s4445_s16 = smov %s3516_s18 }
 0x512   :  { %18 = sbr.rel (!%p16_p5) target bundleno = 12 (0xc), region = 78 }
 0x514   : > { %s4446_s18 = smov %s4438_s25 }
 0x519   :  { %2399 = vsyncpa [#allocation3], 1 }
 0x51a   :  { %2401 = vsyncpa [#allocation3 + $0x1], 1 }
 0x51b   :  { %2402 = vsyncpa [#allocation6], 1 }
 0x51c   :  { %2403 = vsyncpa [#allocation4], 1 }
 0x51d   :  { %2405 = vsyncpa [#allocation4 + $0x1], 1 }

</bundles_post_ra>
